<compile_context>
chip_gen: v5e
topology: v5e:2x2
jax: 0.10.0
libtpu: 0.0.40
codegen_flags: <defaults>
</compile_context>

<pallas_src>
import jax
import jax.numpy as jnp
from jax import lax
from jax.experimental import pallas as pl
from jax.experimental.pallas import tpu as pltpu

NUM_HEADS = 4
EMBED = 128
LN_EPS = 1e-5
_GELU_C = 0.7978845608028654  # sqrt(2/pi)


def _gelu_tanh(x):
    # tanh-approximate GELU (tanh uses the EUP slot; ~3e-4 max abs error vs
    # exact erf GELU, well inside the 1e-3 check at these activation scales).
    return 0.5 * x * (1.0 + jnp.tanh(_GELU_C * (x + 0.044715 * x * x * x)))


# ---------------------------------------------------------------------------
# fused kernel: branch MLP -> LayerNorm -> 4-head self-attn -> fc1 partial
# accumulate; head MLP on the last grid step.
# ---------------------------------------------------------------------------
def fused_kernel(x_ref, w1_ref, b1_ref, w2_ref, b2_ref, w3_ref, b3_ref,
                 g_ref, beta_ref, wqkv_ref, bqkv_ref, wo_ref, bo_ref,
                 hw1_ref, hb1_ref, hw2_ref, hb2_ref, hw3_ref, hb3_ref,
                 out_ref, acc_ref):
    f32 = jnp.float32
    m = pl.program_id(0)
    last = pl.num_programs(0) - 1

    def mm(x, w_ref):
        # bf16 weights: cast the activation down so the MXU consumes native
        # bf16 x bf16; accumulate in f32.
        return jnp.dot(x.astype(w_ref.dtype), w_ref[...], preferred_element_type=f32)

    # ---- branch: (Linear -> ReLU -> Dropout) x 3 (dropout = identity, eval)
    x = x_ref[...]
    h = jnp.maximum(mm(x, w1_ref) + b1_ref[...], 0.0)
    h = jnp.maximum(mm(h, w2_ref) + b2_ref[...], 0.0)
    h = jnp.maximum(mm(h, w3_ref) + b3_ref[...], 0.0)

    # ---- LayerNorm (biased variance, eps=1e-5) — f32 throughout
    mean = jnp.mean(h, axis=-1, keepdims=True)
    diff = h - mean
    var = jnp.mean(diff * diff, axis=-1, keepdims=True)
    ln = diff * lax.rsqrt(var + LN_EPS) * g_ref[...] + beta_ref[...]

    # ---- MultiheadAttention (embed=128, heads=4, batch_first; the batch of N
    # samples is the sequence; attention dropout inactive in eval mode).
    # 1/sqrt(head_dim) already folded into the Q columns of wqkv/bqkv.
    e = EMBED
    hd = e // NUM_HEADS
    qkv = mm(ln, wqkv_ref) + bqkv_ref[...]

    # TODO(synk): fuse the 4 heads into one block-diagonal [4N,4N] score matmul
    # (sublane-stacked heads) — second-order; kernel is DMA-bound at N=8.
    heads = []
    for hh in range(NUM_HEADS):
        lo = hh * hd
        qh = qkv[:, lo:lo + hd]
        kh = qkv[:, e + lo:e + lo + hd]
        vh = qkv[:, 2 * e + lo:2 * e + lo + hd]
        s = lax.dot_general(qh, kh, (((1,), (1,)), ((), ())),
                            preferred_element_type=f32)           # [n, n]
        s = s - jnp.max(s, axis=-1, keepdims=True)
        p = jnp.exp(s)
        # EUP approximate reciprocal instead of a VALU divide
        p = p * pl.reciprocal(jnp.sum(p, axis=-1, keepdims=True), approx=True)
        heads.append(jnp.dot(p, vh, preferred_element_type=f32))   # [n, hd]
    o = jnp.concatenate(heads, axis=-1)                            # [n, 128]
    attn = mm(o, wo_ref) + bo_ref[...]

    # ---- head fc1 partial:  acc += attn @ head.W1[m-th 128 rows]
    @pl.when(m == 0)
    def _():
        acc_ref[...] = jnp.broadcast_to(hb1_ref[...], acc_ref.shape)
    acc_ref[...] += jnp.dot(attn, hw1_ref[...], preferred_element_type=f32)

    # ---- head MLP once, on the last modality step (f32 weights)
    @pl.when(m == last)
    def _():
        z = _gelu_tanh(acc_ref[...])
        h2 = _gelu_tanh(jnp.dot(z, hw2_ref[...], preferred_element_type=f32) + hb2_ref[...])
        # fc3 lane-padded to 128 output columns (column 0 = prediction)
        out_ref[...] = jnp.dot(h2, hw3_ref[...], preferred_element_type=f32) + hb3_ref[...]


# ---------------------------------------------------------------------------
# wrapper
# ---------------------------------------------------------------------------
def model_forward(features, kp):
    order = kp["order"]
    fpad = kp["fpad"]
    xs = jnp.stack(
        [jnp.pad(features[mod].astype(jnp.float32),
                 ((0, 0), (0, fpad - features[mod].shape[1]))) for mod in order],
        axis=0)                                            # [M, N, fpad]
    Mn, N, _ = xs.shape

    def mspec(shape):   # per-modality stacked array; leading modality axis squeezed
        zeros = (0,) * len(shape)
        return pl.BlockSpec((None,) + shape, lambda m: (m,) + zeros)

    def cspec(shape):   # shared (head) array, constant block across the grid
        zeros = (0,) * len(shape)
        return pl.BlockSpec(shape, lambda m: zeros)

    in_specs = [
        mspec((N, fpad)),                                   # xs
        mspec((fpad, 512)), mspec((1, 512)),                # w1 (bf16), b1
        mspec((512, 256)), mspec((1, 256)),                 # w2 (bf16), b2
        mspec((256, 128)), mspec((1, 128)),                 # w3 (bf16), b3
        mspec((1, 128)), mspec((1, 128)),                   # ln_g, ln_b
        mspec((128, 384)), mspec((1, 384)),                 # wqkv (bf16), bqkv
        mspec((128, 128)), mspec((1, 128)),                 # wo (bf16), bo
        mspec((128, 128)),                                  # head.W1 slice for this modality
        cspec((1, 128)),                                    # head.b1
        cspec((128, 64)), cspec((1, 64)),                   # head.W2, b2
        cspec((64, 128)), cspec((1, 128)),                  # head.W3 (lane-padded), b3
    ]

    args = (xs, kp["w1"], kp["b1"], kp["w2"], kp["b2"], kp["w3"], kp["b3"],
            kp["ln_g"], kp["ln_b"], kp["wqkv"], kp["bqkv"], kp["wo"], kp["bo"],
            kp["hw1"], kp["hb1"], kp["hw2"], kp["hb2"], kp["hw3"], kp["hb3"])

    out = pl.pallas_call(
        fused_kernel,
        out_shape=jax.ShapeDtypeStruct((N, 128), jnp.float32),
        grid_spec=pltpu.PrefetchScalarGridSpec(
            num_scalar_prefetch=0,
            grid=(Mn,),
            in_specs=in_specs,
            out_specs=cspec((N, 128)),
            scratch_shapes=[pltpu.VMEM((N, 128), jnp.float32)]),
        compiler_params=pltpu.CompilerParams(
            dimension_semantics=("arbitrary",)),   # modality axis reduces into acc
    )(*args)
    return out[:, :1]   # prediction lives in lane 0 of the lane-padded output


# ---------------------------------------------------------------------------
# deterministic parameter init (shapes from the PyTorch __init__) + packing
# ---------------------------------------------------------------------------
def _dense(key, fin, fout, scale=0.05):
    kw, kb = jax.random.split(key)
    w = scale * jax.random.normal(kw, (fin, fout), jnp.float32)
    b = scale * jax.random.normal(kb, (1, fout), jnp.float32)
    return w, b


def init_params(key, modalities_features):
    raw = {"branches": {}, "order": list(modalities_features.keys())}
    units = [512, 256, 128]
    for modality, fin in modalities_features.items():
        key, k1, k2, k3, k4, k5 = jax.random.split(key, 6)
        w1, b1 = _dense(k1, fin, units[0])
        w2, b2 = _dense(k2, units[0], units[1])
        w3, b3 = _dense(k3, units[1], units[2])
        wqkv, bqkv = _dense(k4, 128, 3 * 128)   # in_proj (q|k|v), stored [in, out]
        wo, bo = _dense(k5, 128, 128)           # out_proj
        raw["branches"][modality] = dict(
            w1=w1, b1=b1, w2=w2, b2=b2, w3=w3, b3=b3,
            ln_g=jnp.ones((1, 128), jnp.float32),
            ln_b=jnp.zeros((1, 128), jnp.float32),
            wqkv=wqkv, bqkv=bqkv, wo=wo, bo=bo)
    feat_comb = 128 * len(modalities_features)
    key, k1, k2, k3 = jax.random.split(key, 4)
    w1, b1 = _dense(k1, feat_comb, 128)
    w2, b2 = _dense(k2, 128, 64)
    w3, b3 = _dense(k3, 64, 1)
    raw["head"] = dict(w1=w1, b1=b1, w2=w2, b2=b2, w3=w3, b3=b3)
    return raw


def pack_params(raw):
    """One-time host-side transform: stack per-modality weights on a leading
    axis, zero-pad input dims to a common multiple-of-8 size, fold the
    attention scale into Wq/bq, cast the big branch/attention weights to
    bf16 (biases / LN / head MLP stay f32), split head.W1 per modality,
    lane-pad fc3."""
    order = raw["order"]
    Mn = len(order)
    fins = [raw["branches"][m]["w1"].shape[0] for m in order]
    fpad = int(-(-max(fins) // 8) * 8)   # multiple of 8 only — do NOT pad to 128 (extra DMA)

    hd = EMBED // NUM_HEADS
    scale = 1.0 / (hd ** 0.5)
    qscale = jnp.concatenate([jnp.full((1, EMBED), scale, jnp.float32),
                              jnp.ones((1, 2 * EMBED), jnp.float32)], axis=1)  # [1, 384]

    bf16 = jnp.bfloat16

    def stack(key, dtype=jnp.float32):
        return jnp.stack([raw["branches"][m][key] for m in order], axis=0).astype(dtype)

    w1 = jnp.stack(
        [jnp.pad(raw["branches"][m]["w1"],
                 ((0, fpad - raw["branches"][m]["w1"].shape[0]), (0, 0)))
         for m in order], axis=0).astype(bf16)

    hp = raw["head"]
    hw1 = jnp.stack([hp["w1"][i * 128:(i + 1) * 128, :] for i in range(Mn)], axis=0)

    return dict(
        order=order, fpad=fpad,
        w1=w1, b1=stack("b1"),
        w2=stack("w2", bf16), b2=stack("b2"),
        w3=stack("w3", bf16), b3=stack("b3"),
        ln_g=stack("ln_g"), ln_b=stack("ln_b"),
        wqkv=(stack("wqkv") * qscale).astype(bf16), bqkv=stack("bqkv") * qscale,
        wo=stack("wo", bf16), bo=stack("bo"),
        hw1=hw1, hb1=hp["b1"],
        hw2=hp["w2"], hb2=hp["b2"],
        hw3=jnp.pad(hp["w3"], ((0, 0), (0, 127))),
        hb3=jnp.pad(hp["b3"], ((0, 0), (0, 127))),
    )


# ---------------------------------------------------------------------------
# pure-JAX f32 reference (exact-erf GELU, unfolded attention scale)
# ---------------------------------------------------------------------------
def reference_forward(features, raw):
    outs = []
    for m in raw["order"]:
        x = features[m]
        p = raw["branches"][m]
        h = jax.nn.relu(x @ p["w1"] + p["b1"])
        h = jax.nn.relu(h @ p["w2"] + p["b2"])
        h = jax.nn.relu(h @ p["w3"] + p["b3"])
        mean = h.mean(-1, keepdims=True)
        var = ((h - mean) ** 2).mean(-1, keepdims=True)
        ln = (h - mean) / jnp.sqrt(var + LN_EPS) * p["ln_g"] + p["ln_b"]
        n = ln.shape[0]
        qkv = ln @ p["wqkv"] + p["bqkv"]
        q, k, v = jnp.split(qkv, 3, axis=-1)
        hd = EMBED // NUM_HEADS
        qh = q.reshape(n, NUM_HEADS, hd).transpose(1, 0, 2) / jnp.sqrt(hd)
        kh = k.reshape(n, NUM_HEADS, hd).transpose(1, 0, 2)
        vh = v.reshape(n, NUM_HEADS, hd).transpose(1, 0, 2)
        s = jnp.einsum("hnd,hmd->hnm", qh, kh)
        a = jax.nn.softmax(s, axis=-1)
        o = jnp.einsum("hnm,hmd->hnd", a, vh).transpose(1, 0, 2).reshape(n, EMBED)
        outs.append(o @ p["wo"] + p["bo"])
    z = jnp.concatenate(outs, axis=1)
    hp = raw["head"]
    h = jax.nn.gelu(z @ hp["w1"] + hp["b1"], approximate=False)
    h = jax.nn.gelu(h @ hp["w2"] + hp["b2"], approximate=False)
    return h @ hp["w3"] + hp["b3"]


# ---------------------------------------------------------------------------
if __name__ == "__main__":
    key = jax.random.PRNGKey(0)
    modalities_features = {"mri": 32, "eeg": 48}
    N = 8  # samples; also the "sequence" length seen by self-attention

    key, kparam, kx1, kx2 = jax.random.split(key, 4)
    raw = init_params(kparam, modalities_features)
    kernel_params = pack_params(raw)
    features = {
        "mri": jax.random.normal(kx1, (N, modalities_features["mri"]), jnp.float32),
        "eeg": jax.random.normal(kx2, (N, modalities_features["eeg"]), jnp.float32),
    }

    out = model_forward(features, kernel_params)
    out = jax.block_until_ready(out)

    ref = reference_forward(features, raw)
    assert out.shape == (N, 1), out.shape
    assert jnp.allclose(out, ref, atol=1e-3, rtol=1e-3), "kernel/reference mismatch"
    print("KERNEL_OK")
</pallas_src>

<mosaic_0001>
module attributes {stable_mosaic.version = 11 : i64} {
  func.func @fused_kernel(%arg0: i32, %arg1: memref<1x8x48xf32, #tpu.memory_space<vmem>>, %arg2: memref<1x48x512xbf16, #tpu.memory_space<vmem>>, %arg3: memref<1x1x512xf32, #tpu.memory_space<vmem>>, %arg4: memref<1x512x256xbf16, #tpu.memory_space<vmem>>, %arg5: memref<1x1x256xf32, #tpu.memory_space<vmem>>, %arg6: memref<1x256x128xbf16, #tpu.memory_space<vmem>>, %arg7: memref<1x1x128xf32, #tpu.memory_space<vmem>>, %arg8: memref<1x1x128xf32, #tpu.memory_space<vmem>>, %arg9: memref<1x1x128xf32, #tpu.memory_space<vmem>>, %arg10: memref<1x128x384xbf16, #tpu.memory_space<vmem>>, %arg11: memref<1x1x384xf32, #tpu.memory_space<vmem>>, %arg12: memref<1x128x128xbf16, #tpu.memory_space<vmem>>, %arg13: memref<1x1x128xf32, #tpu.memory_space<vmem>>, %arg14: memref<1x128x128xf32, #tpu.memory_space<vmem>>, %arg15: memref<1x128xf32, #tpu.memory_space<vmem>>, %arg16: memref<128x64xf32, #tpu.memory_space<vmem>>, %arg17: memref<1x64xf32, #tpu.memory_space<vmem>>, %arg18: memref<64x128xf32, #tpu.memory_space<vmem>>, %arg19: memref<1x128xf32, #tpu.memory_space<vmem>>, %arg20: memref<8x128xf32, #tpu.memory_space<vmem>>, %arg21: memref<8x128xf32, #tpu.memory_space<vmem>>) attributes {dimension_semantics = [#tpu.dimension_semantics<arbitrary>], iteration_bounds = array<i64: 2>, scalar_prefetch = 0 : i64, scratch_operands = 1 : i64, tpu.core_type = #tpu.core_type<tc>, window_params = [{transform_indices = @transform_0, window_bounds = array<i64: 1, 8, 48>}, {transform_indices = @transform_1, window_bounds = array<i64: 1, 48, 512>}, {transform_indices = @transform_2, window_bounds = array<i64: 1, 1, 512>}, {transform_indices = @transform_3, window_bounds = array<i64: 1, 512, 256>}, {transform_indices = @transform_4, window_bounds = array<i64: 1, 1, 256>}, {transform_indices = @transform_5, window_bounds = array<i64: 1, 256, 128>}, {transform_indices = @transform_6, window_bounds = array<i64: 1, 1, 128>}, {transform_indices = @transform_7, window_bounds = array<i64: 1, 1, 128>}, {transform_indices = @transform_8, window_bounds = array<i64: 1, 1, 128>}, {transform_indices = @transform_9, window_bounds = array<i64: 1, 128, 384>}, {transform_indices = @transform_10, window_bounds = array<i64: 1, 1, 384>}, {transform_indices = @transform_11, window_bounds = array<i64: 1, 128, 128>}, {transform_indices = @transform_12, window_bounds = array<i64: 1, 1, 128>}, {transform_indices = @transform_13, window_bounds = array<i64: 1, 128, 128>}, {pipeline_mode = #tpu.pipeline_mode<synchronous>, transform_indices = @transform_14, window_bounds = array<i64: 1, 128>}, {pipeline_mode = #tpu.pipeline_mode<synchronous>, transform_indices = @transform_15, window_bounds = array<i64: 128, 64>}, {pipeline_mode = #tpu.pipeline_mode<synchronous>, transform_indices = @transform_16, window_bounds = array<i64: 1, 64>}, {pipeline_mode = #tpu.pipeline_mode<synchronous>, transform_indices = @transform_17, window_bounds = array<i64: 64, 128>}, {pipeline_mode = #tpu.pipeline_mode<synchronous>, transform_indices = @transform_18, window_bounds = array<i64: 1, 128>}, {pipeline_mode = #tpu.pipeline_mode<synchronous>, transform_indices = @transform_19, window_bounds = array<i64: 8, 128>}]} {
    %c0 = arith.constant 0 : index
    %c0_0 = arith.constant 0 : index
    %c0_1 = arith.constant 0 : index
    %0 = vector.load %arg1[%c0, %c0_0, %c0_1] : memref<1x8x48xf32, #tpu.memory_space<vmem>>, vector<1x8x48xf32>
    %1 = vector.shape_cast %0 : vector<1x8x48xf32> to vector<8x48xf32>
    %2 = arith.truncf %1 : vector<8x48xf32> to vector<8x48xbf16>
    %c0_2 = arith.constant 0 : index
    %c0_3 = arith.constant 0 : index
    %c0_4 = arith.constant 0 : index
    %3 = vector.load %arg2[%c0_2, %c0_3, %c0_4] : memref<1x48x512xbf16, #tpu.memory_space<vmem>>, vector<1x48x512xbf16>
    %4 = vector.shape_cast %3 : vector<1x48x512xbf16> to vector<48x512xbf16>
    %cst = arith.constant dense<0.000000e+00> : vector<8x512xf32>
    %5 = tpu.matmul %2, %4, %cst {dimension_numbers = #tpu.dot_dimension_numbers<[1], [0], [0], [1], [0, 0, 1, 1], [], []>} : vector<8x48xbf16>, vector<48x512xbf16>, vector<8x512xf32> -> vector<8x512xf32>
    %c0_5 = arith.constant 0 : index
    %c0_6 = arith.constant 0 : index
    %c0_7 = arith.constant 0 : index
    %6 = vector.load %arg3[%c0_5, %c0_6, %c0_7] : memref<1x1x512xf32, #tpu.memory_space<vmem>>, vector<1x1x512xf32>
    %7 = vector.shape_cast %6 : vector<1x1x512xf32> to vector<1x512xf32>
    %8 = vector.broadcast %7 : vector<1x512xf32> to vector<8x512xf32>
    %9 = arith.addf %5, %8 : vector<8x512xf32>
    %cst_8 = arith.constant 0.000000e+00 : f32
    %10 = vector.broadcast %cst_8 : f32 to vector<8x512xf32>
    %11 = arith.maximumf %9, %10 : vector<8x512xf32>
    %12 = arith.truncf %11 : vector<8x512xf32> to vector<8x512xbf16>
    %c0_9 = arith.constant 0 : index
    %c0_10 = arith.constant 0 : index
    %c0_11 = arith.constant 0 : index
    %13 = vector.load %arg4[%c0_9, %c0_10, %c0_11] : memref<1x512x256xbf16, #tpu.memory_space<vmem>>, vector<1x512x256xbf16>
    %14 = vector.shape_cast %13 : vector<1x512x256xbf16> to vector<512x256xbf16>
    %cst_12 = arith.constant dense<0.000000e+00> : vector<8x256xf32>
    %15 = tpu.matmul %12, %14, %cst_12 {dimension_numbers = #tpu.dot_dimension_numbers<[1], [0], [0], [1], [0, 0, 1, 1], [], []>} : vector<8x512xbf16>, vector<512x256xbf16>, vector<8x256xf32> -> vector<8x256xf32>
    %c0_13 = arith.constant 0 : index
    %c0_14 = arith.constant 0 : index
    %c0_15 = arith.constant 0 : index
    %16 = vector.load %arg5[%c0_13, %c0_14, %c0_15] : memref<1x1x256xf32, #tpu.memory_space<vmem>>, vector<1x1x256xf32>
    %17 = vector.shape_cast %16 : vector<1x1x256xf32> to vector<1x256xf32>
    %18 = vector.broadcast %17 : vector<1x256xf32> to vector<8x256xf32>
    %19 = arith.addf %15, %18 : vector<8x256xf32>
    %cst_16 = arith.constant 0.000000e+00 : f32
    %20 = vector.broadcast %cst_16 : f32 to vector<8x256xf32>
    %21 = arith.maximumf %19, %20 : vector<8x256xf32>
    %22 = arith.truncf %21 : vector<8x256xf32> to vector<8x256xbf16>
    %c0_17 = arith.constant 0 : index
    %c0_18 = arith.constant 0 : index
    %c0_19 = arith.constant 0 : index
    %23 = vector.load %arg6[%c0_17, %c0_18, %c0_19] : memref<1x256x128xbf16, #tpu.memory_space<vmem>>, vector<1x256x128xbf16>
    %24 = vector.shape_cast %23 : vector<1x256x128xbf16> to vector<256x128xbf16>
    %cst_20 = arith.constant dense<0.000000e+00> : vector<8x128xf32>
    %25 = tpu.matmul %22, %24, %cst_20 {dimension_numbers = #tpu.dot_dimension_numbers<[1], [0], [0], [1], [0, 0, 1, 1], [], []>} : vector<8x256xbf16>, vector<256x128xbf16>, vector<8x128xf32> -> vector<8x128xf32>
    %c0_21 = arith.constant 0 : index
    %c0_22 = arith.constant 0 : index
    %c0_23 = arith.constant 0 : index
    %26 = vector.load %arg7[%c0_21, %c0_22, %c0_23] : memref<1x1x128xf32, #tpu.memory_space<vmem>>, vector<1x1x128xf32>
    %27 = vector.shape_cast %26 : vector<1x1x128xf32> to vector<1x128xf32>
    %28 = vector.broadcast %27 : vector<1x128xf32> to vector<8x128xf32>
    %29 = arith.addf %25, %28 : vector<8x128xf32>
    %cst_24 = arith.constant 0.000000e+00 : f32
    %30 = vector.broadcast %cst_24 : f32 to vector<8x128xf32>
    %31 = arith.maximumf %29, %30 : vector<8x128xf32>
    %cst_25 = arith.constant dense<0.000000e+00> : vector<8xf32>
    %32 = vector.multi_reduction <add>, %31, %cst_25 [1] : vector<8x128xf32> to vector<8xf32>
    %33 = vector.shape_cast %32 : vector<8xf32> to vector<8x1xf32>
    %cst_26 = arith.constant 1.280000e+02 : f32
    %34 = vector.broadcast %cst_26 : f32 to vector<8x1xf32>
    %35 = arith.divf %33, %34 : vector<8x1xf32>
    %36 = vector.broadcast %35 : vector<8x1xf32> to vector<8x128xf32>
    %37 = arith.subf %31, %36 : vector<8x128xf32>
    %38 = arith.mulf %37, %37 : vector<8x128xf32>
    %cst_27 = arith.constant dense<0.000000e+00> : vector<8xf32>
    %39 = vector.multi_reduction <add>, %38, %cst_27 [1] : vector<8x128xf32> to vector<8xf32>
    %40 = vector.shape_cast %39 : vector<8xf32> to vector<8x1xf32>
    %cst_28 = arith.constant 1.280000e+02 : f32
    %41 = vector.broadcast %cst_28 : f32 to vector<8x1xf32>
    %42 = arith.divf %40, %41 : vector<8x1xf32>
    %cst_29 = arith.constant 9.99999974E-6 : f32
    %43 = vector.broadcast %cst_29 : f32 to vector<8x1xf32>
    %44 = arith.addf %42, %43 : vector<8x1xf32>
    %45 = math.rsqrt %44 : vector<8x1xf32>
    %46 = vector.broadcast %45 : vector<8x1xf32> to vector<8x128xf32>
    %47 = arith.mulf %37, %46 : vector<8x128xf32>
    %c0_30 = arith.constant 0 : index
    %c0_31 = arith.constant 0 : index
    %c0_32 = arith.constant 0 : index
    %48 = vector.load %arg8[%c0_30, %c0_31, %c0_32] : memref<1x1x128xf32, #tpu.memory_space<vmem>>, vector<1x1x128xf32>
    %49 = vector.shape_cast %48 : vector<1x1x128xf32> to vector<1x128xf32>
    %50 = vector.broadcast %49 : vector<1x128xf32> to vector<8x128xf32>
    %51 = arith.mulf %47, %50 : vector<8x128xf32>
    %c0_33 = arith.constant 0 : index
    %c0_34 = arith.constant 0 : index
    %c0_35 = arith.constant 0 : index
    %52 = vector.load %arg9[%c0_33, %c0_34, %c0_35] : memref<1x1x128xf32, #tpu.memory_space<vmem>>, vector<1x1x128xf32>
    %53 = vector.shape_cast %52 : vector<1x1x128xf32> to vector<1x128xf32>
    %54 = vector.broadcast %53 : vector<1x128xf32> to vector<8x128xf32>
    %55 = arith.addf %51, %54 : vector<8x128xf32>
    %56 = arith.truncf %55 : vector<8x128xf32> to vector<8x128xbf16>
    %c0_36 = arith.constant 0 : index
    %c0_37 = arith.constant 0 : index
    %c0_38 = arith.constant 0 : index
    %57 = vector.load %arg10[%c0_36, %c0_37, %c0_38] : memref<1x128x384xbf16, #tpu.memory_space<vmem>>, vector<1x128x384xbf16>
    %58 = vector.shape_cast %57 : vector<1x128x384xbf16> to vector<128x384xbf16>
    %cst_39 = arith.constant dense<0.000000e+00> : vector<8x384xf32>
    %59 = tpu.matmul %56, %58, %cst_39 {dimension_numbers = #tpu.dot_dimension_numbers<[1], [0], [0], [1], [0, 0, 1, 1], [], []>} : vector<8x128xbf16>, vector<128x384xbf16>, vector<8x384xf32> -> vector<8x384xf32>
    %c0_40 = arith.constant 0 : index
    %c0_41 = arith.constant 0 : index
    %c0_42 = arith.constant 0 : index
    %60 = vector.load %arg11[%c0_40, %c0_41, %c0_42] : memref<1x1x384xf32, #tpu.memory_space<vmem>>, vector<1x1x384xf32>
    %61 = vector.shape_cast %60 : vector<1x1x384xf32> to vector<1x384xf32>
    %62 = vector.broadcast %61 : vector<1x384xf32> to vector<8x384xf32>
    %63 = arith.addf %59, %62 : vector<8x384xf32>
    %64 = vector.extract_strided_slice %63 {offsets = [0, 0], sizes = [8, 32], strides = [1, 1]} : vector<8x384xf32> to vector<8x32xf32>
    %65 = vector.extract_strided_slice %63 {offsets = [0, 128], sizes = [8, 32], strides = [1, 1]} : vector<8x384xf32> to vector<8x32xf32>
    %66 = vector.extract_strided_slice %63 {offsets = [0, 256], sizes = [8, 32], strides = [1, 1]} : vector<8x384xf32> to vector<8x32xf32>
    %cst_43 = arith.constant dense<0.000000e+00> : vector<8x8xf32>
    %67 = tpu.matmul %64, %65, %cst_43 {dimension_numbers = #tpu.dot_dimension_numbers<[1], [1], [0], [0], [0, 0, 1, 0], [], []>} : vector<8x32xf32>, vector<8x32xf32>, vector<8x8xf32> -> vector<8x8xf32>
    %cst_44 = arith.constant dense<0xFF800000> : vector<8xf32>
    %68 = vector.multi_reduction <maximumf>, %67, %cst_44 [1] : vector<8x8xf32> to vector<8xf32>
    %69 = vector.shape_cast %68 : vector<8xf32> to vector<8x1xf32>
    %70 = vector.broadcast %69 : vector<8x1xf32> to vector<8x8xf32>
    %71 = arith.subf %67, %70 : vector<8x8xf32>
    %72 = math.exp %71 : vector<8x8xf32>
    %cst_45 = arith.constant dense<0.000000e+00> : vector<8xf32>
    %73 = vector.multi_reduction <add>, %72, %cst_45 [1] : vector<8x8xf32> to vector<8xf32>
    %74 = vector.shape_cast %73 : vector<8xf32> to vector<8x1xf32>
    %75 = tpu.reciprocal %74 {approx = true} : vector<8x1xf32> -> vector<8x1xf32>
    %76 = vector.broadcast %75 : vector<8x1xf32> to vector<8x8xf32>
    %77 = arith.mulf %72, %76 : vector<8x8xf32>
    %cst_46 = arith.constant dense<0.000000e+00> : vector<8x32xf32>
    %78 = tpu.matmul %77, %66, %cst_46 {dimension_numbers = #tpu.dot_dimension_numbers<[1], [0], [0], [1], [0, 0, 1, 1], [], []>} : vector<8x8xf32>, vector<8x32xf32>, vector<8x32xf32> -> vector<8x32xf32>
    %79 = vector.extract_strided_slice %63 {offsets = [0, 32], sizes = [8, 32], strides = [1, 1]} : vector<8x384xf32> to vector<8x32xf32>
    %80 = vector.extract_strided_slice %63 {offsets = [0, 160], sizes = [8, 32], strides = [1, 1]} : vector<8x384xf32> to vector<8x32xf32>
    %81 = vector.extract_strided_slice %63 {offsets = [0, 288], sizes = [8, 32], strides = [1, 1]} : vector<8x384xf32> to vector<8x32xf32>
    %cst_47 = arith.constant dense<0.000000e+00> : vector<8x8xf32>
    %82 = tpu.matmul %79, %80, %cst_47 {dimension_numbers = #tpu.dot_dimension_numbers<[1], [1], [0], [0], [0, 0, 1, 0], [], []>} : vector<8x32xf32>, vector<8x32xf32>, vector<8x8xf32> -> vector<8x8xf32>
    %cst_48 = arith.constant dense<0xFF800000> : vector<8xf32>
    %83 = vector.multi_reduction <maximumf>, %82, %cst_48 [1] : vector<8x8xf32> to vector<8xf32>
    %84 = vector.shape_cast %83 : vector<8xf32> to vector<8x1xf32>
    %85 = vector.broadcast %84 : vector<8x1xf32> to vector<8x8xf32>
    %86 = arith.subf %82, %85 : vector<8x8xf32>
    %87 = math.exp %86 : vector<8x8xf32>
    %cst_49 = arith.constant dense<0.000000e+00> : vector<8xf32>
    %88 = vector.multi_reduction <add>, %87, %cst_49 [1] : vector<8x8xf32> to vector<8xf32>
    %89 = vector.shape_cast %88 : vector<8xf32> to vector<8x1xf32>
    %90 = tpu.reciprocal %89 {approx = true} : vector<8x1xf32> -> vector<8x1xf32>
    %91 = vector.broadcast %90 : vector<8x1xf32> to vector<8x8xf32>
    %92 = arith.mulf %87, %91 : vector<8x8xf32>
    %cst_50 = arith.constant dense<0.000000e+00> : vector<8x32xf32>
    %93 = tpu.matmul %92, %81, %cst_50 {dimension_numbers = #tpu.dot_dimension_numbers<[1], [0], [0], [1], [0, 0, 1, 1], [], []>} : vector<8x8xf32>, vector<8x32xf32>, vector<8x32xf32> -> vector<8x32xf32>
    %94 = vector.extract_strided_slice %63 {offsets = [0, 64], sizes = [8, 32], strides = [1, 1]} : vector<8x384xf32> to vector<8x32xf32>
    %95 = vector.extract_strided_slice %63 {offsets = [0, 192], sizes = [8, 32], strides = [1, 1]} : vector<8x384xf32> to vector<8x32xf32>
    %96 = vector.extract_strided_slice %63 {offsets = [0, 320], sizes = [8, 32], strides = [1, 1]} : vector<8x384xf32> to vector<8x32xf32>
    %cst_51 = arith.constant dense<0.000000e+00> : vector<8x8xf32>
    %97 = tpu.matmul %94, %95, %cst_51 {dimension_numbers = #tpu.dot_dimension_numbers<[1], [1], [0], [0], [0, 0, 1, 0], [], []>} : vector<8x32xf32>, vector<8x32xf32>, vector<8x8xf32> -> vector<8x8xf32>
    %cst_52 = arith.constant dense<0xFF800000> : vector<8xf32>
    %98 = vector.multi_reduction <maximumf>, %97, %cst_52 [1] : vector<8x8xf32> to vector<8xf32>
    %99 = vector.shape_cast %98 : vector<8xf32> to vector<8x1xf32>
    %100 = vector.broadcast %99 : vector<8x1xf32> to vector<8x8xf32>
    %101 = arith.subf %97, %100 : vector<8x8xf32>
    %102 = math.exp %101 : vector<8x8xf32>
    %cst_53 = arith.constant dense<0.000000e+00> : vector<8xf32>
    %103 = vector.multi_reduction <add>, %102, %cst_53 [1] : vector<8x8xf32> to vector<8xf32>
    %104 = vector.shape_cast %103 : vector<8xf32> to vector<8x1xf32>
    %105 = tpu.reciprocal %104 {approx = true} : vector<8x1xf32> -> vector<8x1xf32>
    %106 = vector.broadcast %105 : vector<8x1xf32> to vector<8x8xf32>
    %107 = arith.mulf %102, %106 : vector<8x8xf32>
    %cst_54 = arith.constant dense<0.000000e+00> : vector<8x32xf32>
    %108 = tpu.matmul %107, %96, %cst_54 {dimension_numbers = #tpu.dot_dimension_numbers<[1], [0], [0], [1], [0, 0, 1, 1], [], []>} : vector<8x8xf32>, vector<8x32xf32>, vector<8x32xf32> -> vector<8x32xf32>
    %109 = vector.extract_strided_slice %63 {offsets = [0, 96], sizes = [8, 32], strides = [1, 1]} : vector<8x384xf32> to vector<8x32xf32>
    %110 = vector.extract_strided_slice %63 {offsets = [0, 224], sizes = [8, 32], strides = [1, 1]} : vector<8x384xf32> to vector<8x32xf32>
    %111 = vector.extract_strided_slice %63 {offsets = [0, 352], sizes = [8, 32], strides = [1, 1]} : vector<8x384xf32> to vector<8x32xf32>
    %cst_55 = arith.constant dense<0.000000e+00> : vector<8x8xf32>
    %112 = tpu.matmul %109, %110, %cst_55 {dimension_numbers = #tpu.dot_dimension_numbers<[1], [1], [0], [0], [0, 0, 1, 0], [], []>} : vector<8x32xf32>, vector<8x32xf32>, vector<8x8xf32> -> vector<8x8xf32>
    %cst_56 = arith.constant dense<0xFF800000> : vector<8xf32>
    %113 = vector.multi_reduction <maximumf>, %112, %cst_56 [1] : vector<8x8xf32> to vector<8xf32>
    %114 = vector.shape_cast %113 : vector<8xf32> to vector<8x1xf32>
    %115 = vector.broadcast %114 : vector<8x1xf32> to vector<8x8xf32>
    %116 = arith.subf %112, %115 : vector<8x8xf32>
    %117 = math.exp %116 : vector<8x8xf32>
    %cst_57 = arith.constant dense<0.000000e+00> : vector<8xf32>
    %118 = vector.multi_reduction <add>, %117, %cst_57 [1] : vector<8x8xf32> to vector<8xf32>
    %119 = vector.shape_cast %118 : vector<8xf32> to vector<8x1xf32>
    %120 = tpu.reciprocal %119 {approx = true} : vector<8x1xf32> -> vector<8x1xf32>
    %121 = vector.broadcast %120 : vector<8x1xf32> to vector<8x8xf32>
    %122 = arith.mulf %117, %121 : vector<8x8xf32>
    %cst_58 = arith.constant dense<0.000000e+00> : vector<8x32xf32>
    %123 = tpu.matmul %122, %111, %cst_58 {dimension_numbers = #tpu.dot_dimension_numbers<[1], [0], [0], [1], [0, 0, 1, 1], [], []>} : vector<8x8xf32>, vector<8x32xf32>, vector<8x32xf32> -> vector<8x32xf32>
    %124 = tpu.concatenate %78, %93, %108, %123 in 1 : vector<8x32xf32>, vector<8x32xf32>, vector<8x32xf32>, vector<8x32xf32> -> vector<8x128xf32>
    %125 = arith.truncf %124 : vector<8x128xf32> to vector<8x128xbf16>
    %c0_59 = arith.constant 0 : index
    %c0_60 = arith.constant 0 : index
    %c0_61 = arith.constant 0 : index
    %126 = vector.load %arg12[%c0_59, %c0_60, %c0_61] : memref<1x128x128xbf16, #tpu.memory_space<vmem>>, vector<1x128x128xbf16>
    %127 = vector.shape_cast %126 : vector<1x128x128xbf16> to vector<128x128xbf16>
    %cst_62 = arith.constant dense<0.000000e+00> : vector<8x128xf32>
    %128 = tpu.matmul %125, %127, %cst_62 {dimension_numbers = #tpu.dot_dimension_numbers<[1], [0], [0], [1], [0, 0, 1, 1], [], []>} : vector<8x128xbf16>, vector<128x128xbf16>, vector<8x128xf32> -> vector<8x128xf32>
    %c0_63 = arith.constant 0 : index
    %c0_64 = arith.constant 0 : index
    %c0_65 = arith.constant 0 : index
    %129 = vector.load %arg13[%c0_63, %c0_64, %c0_65] : memref<1x1x128xf32, #tpu.memory_space<vmem>>, vector<1x1x128xf32>
    %130 = vector.shape_cast %129 : vector<1x1x128xf32> to vector<1x128xf32>
    %131 = vector.broadcast %130 : vector<1x128xf32> to vector<8x128xf32>
    %132 = arith.addf %128, %131 : vector<8x128xf32>
    %c0_i32 = arith.constant 0 : i32
    %133 = arith.cmpi eq, %arg0, %c0_i32 : i32
    %134 = arith.extui %133 : i1 to i32
    %c0_i32_66 = arith.constant 0 : i32
    %135 = arith.cmpi ne, %134, %c0_i32_66 : i32
    scf.if %135 {
      %c0_76 = arith.constant 0 : index
      %c0_77 = arith.constant 0 : index
      %145 = vector.load %arg15[%c0_76, %c0_77] : memref<1x128xf32, #tpu.memory_space<vmem>>, vector<1x128xf32>
      %146 = vector.shape_cast %145 : vector<1x128xf32> to vector<1x128xf32>
      %147 = vector.broadcast %146 : vector<1x128xf32> to vector<8x128xf32>
      %c0_78 = arith.constant 0 : index
      %c0_79 = arith.constant 0 : index
      %148 = vector.load %arg21[%c0_78, %c0_79] : memref<8x128xf32, #tpu.memory_space<vmem>>, vector<8x128xf32>
      tpu.vector_store %arg21[%c0_78, %c0_79], %147 {strides = array<i32>} : memref<8x128xf32, #tpu.memory_space<vmem>>, vector<8x128xf32>,
    } else {
    }
    %c0_67 = arith.constant 0 : index
    %c0_68 = arith.constant 0 : index
    %136 = vector.load %arg21[%c0_67, %c0_68] : memref<8x128xf32, #tpu.memory_space<vmem>>, vector<8x128xf32>
    %c0_69 = arith.constant 0 : index
    %c0_70 = arith.constant 0 : index
    %c0_71 = arith.constant 0 : index
    %137 = vector.load %arg14[%c0_69, %c0_70, %c0_71] : memref<1x128x128xf32, #tpu.memory_space<vmem>>, vector<1x128x128xf32>
    %138 = vector.shape_cast %137 : vector<1x128x128xf32> to vector<128x128xf32>
    %cst_72 = arith.constant dense<0.000000e+00> : vector<8x128xf32>
    %139 = tpu.matmul %132, %138, %cst_72 {dimension_numbers = #tpu.dot_dimension_numbers<[1], [0], [0], [1], [0, 0, 1, 1], [], []>} : vector<8x128xf32>, vector<128x128xf32>, vector<8x128xf32> -> vector<8x128xf32>
    %140 = arith.addf %136, %139 : vector<8x128xf32>
    %c0_73 = arith.constant 0 : index
    %c0_74 = arith.constant 0 : index
    %141 = vector.load %arg21[%c0_73, %c0_74] : memref<8x128xf32, #tpu.memory_space<vmem>>, vector<8x128xf32>
    tpu.vector_store %arg21[%c0_73, %c0_74], %140 {strides = array<i32>} : memref<8x128xf32, #tpu.memory_space<vmem>>, vector<8x128xf32>,
    %c1_i32 = arith.constant 1 : i32
    %142 = arith.cmpi eq, %arg0, %c1_i32 : i32
    %143 = arith.extui %142 : i1 to i32
    %c0_i32_75 = arith.constant 0 : i32
    %144 = arith.cmpi ne, %143, %c0_i32_75 : i32
    scf.if %144 {
      %c0_76 = arith.constant 0 : index
      %c0_77 = arith.constant 0 : index
      %145 = vector.load %arg21[%c0_76, %c0_77] : memref<8x128xf32, #tpu.memory_space<vmem>>, vector<8x128xf32>
      %cst_78 = arith.constant 5.000000e-01 : f32
      %146 = vector.broadcast %cst_78 : f32 to vector<8x128xf32>
      %147 = arith.mulf %146, %145 : vector<8x128xf32>
      %cst_79 = arith.constant 4.471500e-02 : f32
      %148 = vector.broadcast %cst_79 : f32 to vector<8x128xf32>
      %149 = arith.mulf %148, %145 : vector<8x128xf32>
      %150 = arith.mulf %149, %145 : vector<8x128xf32>
      %151 = arith.mulf %150, %145 : vector<8x128xf32>
      %152 = arith.addf %145, %151 : vector<8x128xf32>
      %cst_80 = arith.constant 0.797884583 : f32
      %153 = vector.broadcast %cst_80 : f32 to vector<8x128xf32>
      %154 = arith.mulf %153, %152 : vector<8x128xf32>
      %155 = math.tanh %154 : vector<8x128xf32>
      %cst_81 = arith.constant 1.000000e+00 : f32
      %156 = vector.broadcast %cst_81 : f32 to vector<8x128xf32>
      %157 = arith.addf %156, %155 : vector<8x128xf32>
      %158 = arith.mulf %147, %157 : vector<8x128xf32>
      %c0_82 = arith.constant 0 : index
      %c0_83 = arith.constant 0 : index
      %159 = vector.load %arg16[%c0_82, %c0_83] : memref<128x64xf32, #tpu.memory_space<vmem>>, vector<128x64xf32>
      %cst_84 = arith.constant dense<0.000000e+00> : vector<8x64xf32>
      %160 = tpu.matmul %158, %159, %cst_84 {dimension_numbers = #tpu.dot_dimension_numbers<[1], [0], [0], [1], [0, 0, 1, 1], [], []>} : vector<8x128xf32>, vector<128x64xf32>, vector<8x64xf32> -> vector<8x64xf32>
      %c0_85 = arith.constant 0 : index
      %c0_86 = arith.constant 0 : index
      %161 = vector.load %arg17[%c0_85, %c0_86] : memref<1x64xf32, #tpu.memory_space<vmem>>, vector<1x64xf32>
      %162 = vector.broadcast %161 : vector<1x64xf32> to vector<8x64xf32>
      %163 = arith.addf %160, %162 : vector<8x64xf32>
      %cst_87 = arith.constant 5.000000e-01 : f32
      %164 = vector.broadcast %cst_87 : f32 to vector<8x64xf32>
      %165 = arith.mulf %164, %163 : vector<8x64xf32>
      %cst_88 = arith.constant 4.471500e-02 : f32
      %166 = vector.broadcast %cst_88 : f32 to vector<8x64xf32>
      %167 = arith.mulf %166, %163 : vector<8x64xf32>
      %168 = arith.mulf %167, %163 : vector<8x64xf32>
      %169 = arith.mulf %168, %163 : vector<8x64xf32>
      %170 = arith.addf %163, %169 : vector<8x64xf32>
      %cst_89 = arith.constant 0.797884583 : f32
      %171 = vector.broadcast %cst_89 : f32 to vector<8x64xf32>
      %172 = arith.mulf %171, %170 : vector<8x64xf32>
      %173 = math.tanh %172 : vector<8x64xf32>
      %cst_90 = arith.constant 1.000000e+00 : f32
      %174 = vector.broadcast %cst_90 : f32 to vector<8x64xf32>
      %175 = arith.addf %174, %173 : vector<8x64xf32>
      %176 = arith.mulf %165, %175 : vector<8x64xf32>
      %c0_91 = arith.constant 0 : index
      %c0_92 = arith.constant 0 : index
      %177 = vector.load %arg18[%c0_91, %c0_92] : memref<64x128xf32, #tpu.memory_space<vmem>>, vector<64x128xf32>
      %cst_93 = arith.constant dense<0.000000e+00> : vector<8x128xf32>
      %178 = tpu.matmul %176, %177, %cst_93 {dimension_numbers = #tpu.dot_dimension_numbers<[1], [0], [0], [1], [0, 0, 1, 1], [], []>} : vector<8x64xf32>, vector<64x128xf32>, vector<8x128xf32> -> vector<8x128xf32>
      %c0_94 = arith.constant 0 : index
      %c0_95 = arith.constant 0 : index
      %179 = vector.load %arg19[%c0_94, %c0_95] : memref<1x128xf32, #tpu.memory_space<vmem>>, vector<1x128xf32>
      %180 = vector.broadcast %179 : vector<1x128xf32> to vector<8x128xf32>
      %181 = arith.addf %178, %180 : vector<8x128xf32>
      %c0_96 = arith.constant 0 : index
      %c0_97 = arith.constant 0 : index
      %182 = vector.load %arg20[%c0_96, %c0_97] : memref<8x128xf32, #tpu.memory_space<vmem>>, vector<8x128xf32>
      tpu.vector_store %arg20[%c0_96, %c0_97], %181 {strides = array<i32>} : memref<8x128xf32, #tpu.memory_space<vmem>>, vector<8x128xf32>,
    } else {
    }
    return
  }
  func.func @transform_0(%arg0: i32) -> (i32, i32, i32) {
    %c0_i32 = arith.constant 0 : i32
    %c0_i32_0 = arith.constant 0 : i32
    %c0_i32_1 = arith.constant 0 : i32
    return %arg0, %c0_i32, %c0_i32_0 : i32, i32, i32
  }
  func.func @transform_1(%arg0: i32) -> (i32, i32, i32) {
    %c0_i32 = arith.constant 0 : i32
    %c0_i32_0 = arith.constant 0 : i32
    %c0_i32_1 = arith.constant 0 : i32
    return %arg0, %c0_i32, %c0_i32_0 : i32, i32, i32
  }
  func.func @transform_2(%arg0: i32) -> (i32, i32, i32) {
    %c0_i32 = arith.constant 0 : i32
    %c0_i32_0 = arith.constant 0 : i32
    %c0_i32_1 = arith.constant 0 : i32
    return %arg0, %c0_i32, %c0_i32_0 : i32, i32, i32
  }
  func.func @transform_3(%arg0: i32) -> (i32, i32, i32) {
    %c0_i32 = arith.constant 0 : i32
    %c0_i32_0 = arith.constant 0 : i32
    %c0_i32_1 = arith.constant 0 : i32
    return %arg0, %c0_i32, %c0_i32_0 : i32, i32, i32
  }
  func.func @transform_4(%arg0: i32) -> (i32, i32, i32) {
    %c0_i32 = arith.constant 0 : i32
    %c0_i32_0 = arith.constant 0 : i32
    %c0_i32_1 = arith.constant 0 : i32
    return %arg0, %c0_i32, %c0_i32_0 : i32, i32, i32
  }
  func.func @transform_5(%arg0: i32) -> (i32, i32, i32) {
    %c0_i32 = arith.constant 0 : i32
    %c0_i32_0 = arith.constant 0 : i32
    %c0_i32_1 = arith.constant 0 : i32
    return %arg0, %c0_i32, %c0_i32_0 : i32, i32, i32
  }
  func.func @transform_6(%arg0: i32) -> (i32, i32, i32) {
    %c0_i32 = arith.constant 0 : i32
    %c0_i32_0 = arith.constant 0 : i32
    %c0_i32_1 = arith.constant 0 : i32
    return %arg0, %c0_i32, %c0_i32_0 : i32, i32, i32
  }
  func.func @transform_7(%arg0: i32) -> (i32, i32, i32) {
    %c0_i32 = arith.constant 0 : i32
    %c0_i32_0 = arith.constant 0 : i32
    %c0_i32_1 = arith.constant 0 : i32
    return %arg0, %c0_i32, %c0_i32_0 : i32, i32, i32
  }
  func.func @transform_8(%arg0: i32) -> (i32, i32, i32) {
    %c0_i32 = arith.constant 0 : i32
    %c0_i32_0 = arith.constant 0 : i32
    %c0_i32_1 = arith.constant 0 : i32
    return %arg0, %c0_i32, %c0_i32_0 : i32, i32, i32
  }
  func.func @transform_9(%arg0: i32) -> (i32, i32, i32) {
    %c0_i32 = arith.constant 0 : i32
    %c0_i32_0 = arith.constant 0 : i32
    %c0_i32_1 = arith.constant 0 : i32
    return %arg0, %c0_i32, %c0_i32_0 : i32, i32, i32
  }
  func.func @transform_10(%arg0: i32) -> (i32, i32, i32) {
    %c0_i32 = arith.constant 0 : i32
    %c0_i32_0 = arith.constant 0 : i32
    %c0_i32_1 = arith.constant 0 : i32
    return %arg0, %c0_i32, %c0_i32_0 : i32, i32, i32
  }
  func.func @transform_11(%arg0: i32) -> (i32, i32, i32) {
    %c0_i32 = arith.constant 0 : i32
    %c0_i32_0 = arith.constant 0 : i32
    %c0_i32_1 = arith.constant 0 : i32
    return %arg0, %c0_i32, %c0_i32_0 : i32, i32, i32
  }
  func.func @transform_12(%arg0: i32) -> (i32, i32, i32) {
    %c0_i32 = arith.constant 0 : i32
    %c0_i32_0 = arith.constant 0 : i32
    %c0_i32_1 = arith.constant 0 : i32
    return %arg0, %c0_i32, %c0_i32_0 : i32, i32, i32
  }
  func.func @transform_13(%arg0: i32) -> (i32, i32, i32) {
    %c0_i32 = arith.constant 0 : i32
    %c0_i32_0 = arith.constant 0 : i32
    %c0_i32_1 = arith.constant 0 : i32
    return %arg0, %c0_i32, %c0_i32_0 : i32, i32, i32
  }
  func.func @transform_14(%arg0: i32) -> (i32, i32) {
    %c0_i32 = arith.constant 0 : i32
    %c0_i32_0 = arith.constant 0 : i32
    %c0_i32_1 = arith.constant 0 : i32
    return %c0_i32, %c0_i32_0 : i32, i32
  }
  func.func @transform_15(%arg0: i32) -> (i32, i32) {
    %c0_i32 = arith.constant 0 : i32
    %c0_i32_0 = arith.constant 0 : i32
    %c0_i32_1 = arith.constant 0 : i32
    return %c0_i32, %c0_i32_0 : i32, i32
  }
  func.func @transform_16(%arg0: i32) -> (i32, i32) {
    %c0_i32 = arith.constant 0 : i32
    %c0_i32_0 = arith.constant 0 : i32
    %c0_i32_1 = arith.constant 0 : i32
    return %c0_i32, %c0_i32_0 : i32, i32
  }
  func.func @transform_17(%arg0: i32) -> (i32, i32) {
    %c0_i32 = arith.constant 0 : i32
    %c0_i32_0 = arith.constant 0 : i32
    %c0_i32_1 = arith.constant 0 : i32
    return %c0_i32, %c0_i32_0 : i32, i32
  }
  func.func @transform_18(%arg0: i32) -> (i32, i32) {
    %c0_i32 = arith.constant 0 : i32
    %c0_i32_0 = arith.constant 0 : i32
    %c0_i32_1 = arith.constant 0 : i32
    return %c0_i32, %c0_i32_0 : i32, i32
  }
  func.func @transform_19(%arg0: i32) -> (i32, i32) {
    %c0_i32 = arith.constant 0 : i32
    %c0_i32_0 = arith.constant 0 : i32
    %c0_i32_1 = arith.constant 0 : i32
    return %c0_i32, %c0_i32_0 : i32, i32
  }
}

</mosaic_0001>

<bundles_post_ra>
// kernel: tpu_custom_call.1
= control target key start
LH: loop header
LB: loop body
LE: loop exit
PB: predicated region body
PF: predicated region fallthrough
CT: control target
= control target key end

     0   :  { %s5001_s0 = inlined_call_operand.hbm [shape: f32[2,8,48], index: 0, kind: input, shape index: {}]   ;;  %s5002_s1 = inlined_call_operand.vmem [shape: bf16[2,48,512], index: 1, kind: input, shape index: {}]   ;;  %s5003_s2 = inlined_call_operand.hbm [shape: f32[2,1,512], index: 2, kind: input, shape index: {}]   ;;  %s5004_s3 = inlined_call_operand.hbm [shape: bf16[2,512,256], index: 3, kind: input, shape index: {}]   ;;  %s5005_s4 = inlined_call_operand.hbm [shape: f32[2,1,256], index: 4, kind: input, shape index: {}]   ;;  %s5006_s5 = inlined_call_operand.hbm [shape: bf16[2,256,128], index: 5, kind: input, shape index: {}]   ;;  %s5007_s6 = inlined_call_operand.vmem [shape: f32[2,1,128], index: 6, kind: input, shape index: {}]   ;;  %s5008_s7 = inlined_call_operand.hbm [shape: f32[2,1,128], index: 7, kind: input, shape index: {}]   ;;  %s5009_s8 = inlined_call_operand.hbm [shape: f32[2,1,128], index: 8, kind: input, shape index: {}]   ;;  %s5010_s9 = inlined_call_operand.hbm [shape: bf16[2,128,384], index: 9, kind: input, shape index: {}]   ;;  %s5011_s10 = inlined_call_operand.vmem [shape: f32[2,1,384], index: 10, kind: input, shape index: {}]   ;;  %s5012_s11 = inlined_call_operand.hbm [shape: bf16[2,128,128], index: 11, kind: input, shape index: {}]   ;;  %s5013_s12 = inlined_call_operand.vmem [shape: f32[2,1,128], index: 12, kind: input, shape index: {}]   ;;  %s5014_s13 = inlined_call_operand.hbm [shape: f32[2,128,128], index: 13, kind: input, shape index: {}]   ;;  %s5015_s14 = inlined_call_operand.vmem [shape: f32[1,128], index: 14, kind: input, shape index: {}]   ;;  %s5016_s15 = inlined_call_operand.vmem [shape: f32[128,64], index: 15, kind: input, shape index: {}]   ;;  %s5017_s16 = inlined_call_operand.vmem [shape: f32[1,64], index: 16, kind: input, shape index: {}]   ;;  %s5018_s17 = inlined_call_operand.hbm [shape: f32[64,128], index: 17, kind: input, shape index: {}]   ;;  %s5019_s18 = inlined_call_operand.vmem [shape: f32[1,128], index: 18, kind: input, shape index: {}]   ;;  %s5020_s19 = inlined_call_operand.hbm [shape: f32[8,128], index: 19, kind: output, shape index: {}]  }
   0x1   :  { %5043 = sst [smem:[#allocation33_spill]] %s5001_s0 }
   0x2   :  { %5044 = sst [smem:[#allocation34_spill]] %s5002_s1 }
   0x3   :  { %5045 = sst [smem:[#allocation35_spill]] %s5003_s2 }
   0x4   :  { %5046 = sst [smem:[#allocation36_spill]] %s5004_s3 }
   0x5   :  { %5047 = sst [smem:[#allocation37_spill]] %s5005_s4 }
   0x6   :  { %5048 = sst [smem:[#allocation38_spill]] %s5006_s5 }
   0x7   :  { %5049 = sst [smem:[#allocation39_spill]] %s5007_s6 }
   0x8   :  { %5050 = sst [smem:[#allocation40_spill]] %s5008_s7 }
   0x9   :  { %5051 = sst [smem:[#allocation41_spill]] %s5010_s9 }
   0xa   :  { %5052 = sst [smem:[#allocation42_spill]] %s5011_s10 }
   0xb   :  { %5053 = sst [smem:[#allocation43_spill]] %s5013_s12 }
   0xc   :  { %5054 = sst [smem:[#allocation44_spill]] %s5015_s14 }
   0xd   :  { %5055 = sst [smem:[#allocation45_spill]] %s5016_s15 }
   0xe   :  { %5056 = sst [smem:[#allocation46_spill]] %s5017_s16 }
   0xf   :  { %5057 = sst [smem:[#allocation47_spill]] %s5018_s17 }
  0x10   :  { %5058 = sst [smem:[#allocation48_spill]] %s5019_s18 }
  0x11   :  { %5059 = sst [smem:[#allocation49_spill]] %s5020_s19 }
  0x12   :  { %24 = vsyncpa [#allocation4], 0 }
  0x13   :  { %26 = vsyncpa [#allocation4 + $0x1], 0 }
  0x14   :  { %27 = vsyncpa [#allocation7], 0 }
  0x15   :  { %29 = vsyncpa [#allocation7 + $0x1], 0 }
  0x16   :  { %30 = vsyncpa [#allocation10], 0 }
  0x17   :  { %32 = vsyncpa [#allocation10 + $0x1], 0 }
  0x18   :  { %33 = vsyncpa [#allocation13], 0 }
  0x19   :  { %35 = vsyncpa [#allocation13 + $0x1], 0 }
  0x1a   :  { %36 = vsyncpa [#allocation16], 0 }
  0x1b   :  { %38 = vsyncpa [#allocation16 + $0x1], 0 }
  0x1c   :  { %39 = vsyncpa [#allocation19], 0 }
  0x1d   :  { %41 = vsyncpa [#allocation19 + $0x1], 0 }
  0x1e   :  { %42 = vsyncpa [#allocation5], 0  ;;  %s4249_s0 = smov 0   ;;  %s4251_s30 = smov 0  }
  0x1f   :  { %s4253_s20 = smov 0   ;;  %s4255_s21 = smov 0  }
  0x20 LB: > { %5060 = sst [smem:[#allocation30_spill]] %s4131_s20  ;;  %s4268_s1 = sadd.s32 4294967295, %s4135_s21   ;;  %s4135_s21 = sphi %s4255_s21, %s5097_s21   ;;  %s4131_s20 = sphi %s4253_s20, %s5099_s20   ;;  %s4127_s30 = sphi %s4251_s30, %s5101_s30   ;;  %s4123_s0 = sphi %s4249_s0, %s5100_s0  }
  0x21   : > { %s4271_s22 = sadd.s32 1, %s4135_s21   ;;  %s55_s23 = sadd.s32 1, %s4131_s20 }
  0x22   : > { %5061 = sst [smem:[#allocation31_spill]] %s4271_s22  ;;  %s52_s2 = ssub.s32 %s4135_s21, %s4271_s22 }
  0x23   : > { %p53_p0 = scmp.eq.s32.totalorder %s52_s2, 0  ;;  %p62_p1 = scmp.ne.s32.totalorder %s4131_s20, %s4127_s30 }
  0x24   : > { %p63_p2 = scmp.eq.s32.totalorder %s4135_s21, 0  ;;  %p68_p3 = scmp.ne.s32.totalorder %s4127_s30, %s4123_s0 }
  0x25   : > { %s4281_s24 = scalar_select %p53_p0, %s4131_s20, %s55_s23  }
  0x26   : > { %p4283_p4 = por %p63_p2, %p62_p1  ;;  %p69_p5 = scmp.eq.s32.totalorder %s4268_s1, 0 }
  0x27   : > { %5062 = sst [smem:[#allocation32_spill]] %s4281_s24  ;;  %p2888_p6 = scmp.ge.s32.totalorder %s4135_s21, 1 }
  0x28   : > { %p543_p7 = scmp.lt.s32.totalorder %s4135_s21, 3  ;;  %p4292_p8 = por %p69_p5, %p68_p3 }
  0x29   : > { %p2889_p9 = scmp.ne.s32.totalorder %s4268_s1, 0  ;;  %s5066_s17 = sld [smem:[#allocation47_spill]] }
  0x2a   : > { %p4297_p10 = pnand %p2888_p6, %p543_p7  ;;  %s4137_s0 = smov [#allocation20]  }
  0x2b   : > { %s565_s2 = sshll.u32 %s4137_s0, 4  ;;  %p3636_p13 = scmp.lt.s32.totalorder %s4135_s21, 2  ;;  %s566_s2 = int_to_ptr.vmem [resolvable:$true] %s565_s2 }
  0x2c   : > { %p3600_p11 = pneg %p4297_p10  ;;  %s4310_s23 = sand.u32 1, %s4131_s20  }
  0x2d   : > { %s5028_s24 = smov 128   ;;  %s5030_s22 = smov 8  }
  0x2e   : > { %p3601_p12 = pnand %p3600_p11, %p69_p5  ;;  %p4317_p0 = pnand %p3636_p13, %p4283_p4 }
  0x2f   : > { %s563_s29 = sshll.u32 %s5066_s17, 4  ;;  %s4322_s28 = sand.u32 1, %s4135_s21   ;;  %s564_s29 = int_to_ptr.hbm [resolvable:$true] %s563_s29 }
  0x30   : > { %3603 = dma.hbm_to_vmem [thread:$0]  (!%p3601_p12), %s564_s29, 1024, %s566_s2, [#allocation19], %s5028_s24, %s5028_s24, %s5030_s22  }
  0x31   : > { %s2893_s0 = sshll.u32 %s4310_s23, 2  ;;  %s2894_s17 = sshll.u32 %s4135_s21, 2 }
  0x32   : > { %s613_s20 = scalar_lea.vmem [#allocation6], %s2893_s0  ;;  %s5068_s15 = sld [smem:[#allocation35_spill]] }
  0x33   : > { %s621_s19 = sshll.u32 %s613_s20, 4  ;;  %s2898_s25 = sshll.u32 %s4310_s23, 1  ;;  %s622_s19 = int_to_ptr.vmem [resolvable:$true] %s621_s19 }
  0x34   : > { %s5034_s29 = scalar_lea.sflag [#allocation7], %s4322_s28  ;;  %p4333_p2 = pneg %p4317_p0 }
  0x38   : > { %s617_s14 = scalar_lea.hbm %s5068_s15, %s2894_s17 }
  0x39   : > { %s619_s12 = sshll.u32 %s617_s14, 4  ;;  %s3752_s14 = scalar_lea.hbm %s5068_s15, 8  ;;  %s620_s12 = int_to_ptr.hbm [resolvable:$true] %s619_s12 }
  0x3a   : > { %s3745_s2 = sshra.s32 %s620_s12, 4  ;;  %s3746_s2 = int_to_ptr.hbm [resolvable:$true] %s3745_s2 }
  0x3b   : > { %s3747_s24 = scalar_lea.hbm %s3746_s2, 4  ;;  %p3753_p6 = scmp.lt.s32.totalorder %s3746_s2, %s5068_s15 }
  0x3c   : > { %p3748_p1 = scmp.ne.s32.totalorder %s3746_s2, %s3747_s24  ;;  %p3754_p7 = scmp.lt.s32.totalorder %s3752_s14, %s3747_s24 }
  0x3e   : > { %p3750_p3 = pnand %p4333_p2, %p3748_p1  ;;  %p3755_p11 = por %p3754_p7, %p3753_p6 }
  0x40   : > { %p3751_p4 = pneg %p3750_p3 }
  0x42   : > { %p3756_p12 = pnand %p3755_p11, %p3751_p4 }
  0x44   : > { %3759 = shalt.err (!%p3756_p12)
}
  0x45   : > { %3610 = dma.hbm_to_vmem [thread:$0]  (!%p4317_p0), %s620_s12, 64, %s622_s19, %s5034_s29  }
  0x46   : > { %s2899_s0 = sshll.u32 %s4135_s21, 1  ;;  %s5070_s4 = sld [smem:[#allocation37_spill]] }
  0x47   : > { %s654_s6 = scalar_lea.vmem [#allocation9], %s2898_s25  ;;  %s5036_s24 = scalar_lea.sflag [#allocation10], %s4322_s28 }
  0x48   : > { %s662_s18 = sshll.u32 %s654_s6, 4  ;;  %s663_s18 = int_to_ptr.vmem [resolvable:$true] %s662_s18 }
  0x4c   : > { %s658_s17 = scalar_lea.hbm %s5070_s4, %s2899_s0  ;;  %s3782_s19 = scalar_lea.hbm %s5070_s4, 4 }
  0x4d   : > { %s660_s2 = sshll.u32 %s658_s17, 4  ;;  %s661_s2 = int_to_ptr.hbm [resolvable:$true] %s660_s2 }
  0x4e   : > { %s3775_s14 = sshra.s32 %s661_s2, 4  ;;  %s3776_s14 = int_to_ptr.hbm [resolvable:$true] %s3775_s14 }
  0x4f   : > { %s3777_s20 = scalar_lea.hbm %s3776_s14, 2  ;;  %p3783_p4 = scmp.lt.s32.totalorder %s3776_s14, %s5070_s4 }
  0x50   : > { %p3778_p13 = scmp.ne.s32.totalorder %s3776_s14, %s3777_s20  ;;  %p3784_p6 = scmp.lt.s32.totalorder %s3782_s19, %s3777_s20 }
  0x52   : > { %p3780_p1 = pnand %p3778_p13, %p4333_p2  ;;  %p3785_p7 = por %p3784_p6, %p3783_p4 }
  0x54   : > { %p3781_p3 = pneg %p3780_p1 }
  0x56   : > { %p3786_p11 = pnand %p3785_p7, %p3781_p3 }
  0x58   : > { %3789 = shalt.err (!%p3786_p11)
}
  0x59   : > { %3616 = dma.hbm_to_vmem [thread:$0]  (!%p4317_p0), %s661_s2, 32, %s663_s18, %s5036_s24  }
  0x5a   : > { %s5071_s7 = sld [smem:[#allocation40_spill]]  ;;  %s700_s29 = scalar_lea.vmem [#allocation12], %s4310_s23 }
  0x5b   : > { %s707_s16 = sshll.u32 %s700_s29, 4  ;;  %s5035_s17 = scalar_lea.sflag [#allocation13], %s4322_s28  ;;  %s708_s16 = int_to_ptr.vmem [resolvable:$true] %s707_s16 }
  0x60   : > { %s703_s25 = scalar_lea.hbm %s5071_s7, %s4135_s21  ;;  %s3812_s18 = scalar_lea.hbm %s5071_s7, 2 }
  0x61   : > { %s705_s0 = sshll.u32 %s703_s25, 4  ;;  %s706_s0 = int_to_ptr.hbm [resolvable:$true] %s705_s0 }
  0x62   : > { %s3805_s14 = sshra.s32 %s706_s0, 4  ;;  %s3806_s14 = int_to_ptr.hbm [resolvable:$true] %s3805_s14 }
  0x63   : > { %s3807_s20 = scalar_lea.hbm %s3806_s14, 1  ;;  %p3813_p3 = scmp.lt.s32.totalorder %s3806_s14, %s5071_s7 }
  0x64   : > { %p3808_p12 = scmp.ne.s32.totalorder %s3806_s14, %s3807_s20  ;;  %p3814_p4 = scmp.lt.s32.totalorder %s3812_s18, %s3807_s20 }
  0x66   : > { %p3810_p13 = pnand %p3808_p12, %p4333_p2  ;;  %p3815_p6 = por %p3814_p4, %p3813_p3 }
  0x68   : > { %p3811_p1 = pneg %p3810_p13 }
  0x6a   : > { %p3816_p7 = pnand %p3815_p6, %p3811_p1 }
  0x6c   : > { %3819 = shalt.err (!%p3816_p7)
}
  0x6d   : > { %3622 = dma.hbm_to_vmem [thread:$0]  (!%p4317_p0), %s706_s0, 16, %s708_s16, %s5035_s17  }
  0x6e   : > { %s3567_s6 = smul.u32 192, %s4310_s23  ;;  %s5072_s9 = sld [smem:[#allocation41_spill]] }
  0x6f   : > { %s3568_s15 = smul.u32 192, %s4135_s21  ;;  %s5037_s18 = scalar_lea.sflag [#allocation16], %s4322_s28 }
  0x70   : > { %s735_s14 = scalar_lea.vmem [#allocation15], %s3567_s6 }
  0x71   : > { %s743_s20 = sshll.u32 %s735_s14, 4  ;;  %s744_s20 = int_to_ptr.vmem [resolvable:$true] %s743_s20 }
  0x74   : > { %s740_s12 = scalar_lea.hbm %s5072_s9, %s3568_s15  ;;  %s3842_s17 = scalar_lea.hbm %s5072_s9, 384 }
  0x75   : > { %s741_s19 = sshll.u32 %s740_s12, 4  ;;  %s742_s19 = int_to_ptr.hbm [resolvable:$true] %s741_s19 }
  0x76   : > { %s3835_s2 = sshra.s32 %s742_s19, 4  ;;  %s3836_s2 = int_to_ptr.hbm [resolvable:$true] %s3835_s2 }
  0x77   : > { %s3837_s10 = scalar_lea.hbm %s3836_s2, 192  ;;  %p3843_p1 = scmp.lt.s32.totalorder %s3836_s2, %s5072_s9 }
  0x78   : > { %p3838_p11 = scmp.ne.s32.totalorder %s3836_s2, %s3837_s10  ;;  %p3844_p3 = scmp.lt.s32.totalorder %s3842_s17, %s3837_s10 }
  0x7a   : > { %p3840_p12 = pnand %p3838_p11, %p4333_p2  ;;  %p3845_p4 = por %p3844_p3, %p3843_p1 }
  0x7c   : > { %p3841_p13 = pneg %p3840_p12 }
  0x7e   : > { %p3846_p6 = pnand %p3845_p4, %p3841_p13 }
  0x80   : > { %3849 = shalt.err (!%p3846_p6)
}
  0x81   : > { %s4140_s6 = smov 192   ;;  %s4141_s15 = smov 12  }
  0x82   : > { %3628 = dma.hbm_to_vmem [thread:$0]  (!%p4317_p0), %s742_s19, 3072, %s744_s20, %s5037_s18, %s4140_s6, %s4140_s6, %s4141_s15  }
  0x83   : > { %s2891_s29 = sshll.u32 %s4310_s23, 3  ;;  %s2892_s12 = sshll.u32 %s4135_s21, 3 }
  0x84   : > { %s5073_s2 = sld [smem:[#allocation33_spill]]  ;;  %s586_s0 = scalar_lea.vmem [#allocation3], %s2891_s29 }
  0x85   : > { %s594_s16 = sshll.u32 %s586_s0, 4  ;;  %s583_s25 = scalar_lea.sflag [#allocation4], %s4310_s23  ;;  %s595_s16 = int_to_ptr.vmem [resolvable:$true] %s594_s16 }
  0x8a   : > { %s590_s17 = scalar_lea.hbm %s5073_s2, %s2892_s12  ;;  %s3872_s6 = scalar_lea.hbm %s5073_s2, 16 }
  0x8b   : > { %s592_s10 = sshll.u32 %s590_s17, 4  ;;  %s593_s10 = int_to_ptr.hbm [resolvable:$true] %s592_s10 }
  0x8c   : > { %s3865_s4 = sshra.s32 %s593_s10, 4  ;;  %s3866_s4 = int_to_ptr.hbm [resolvable:$true] %s3865_s4 }
  0x8d   : > { %s3867_s7 = scalar_lea.hbm %s3866_s4, 8  ;;  %p3873_p13 = scmp.lt.s32.totalorder %s3866_s4, %s5073_s2 }
  0x8e   : > { %p3868_p7 = scmp.ne.s32.totalorder %s3866_s4, %s3867_s7  ;;  %p3874_p1 = scmp.lt.s32.totalorder %s3872_s6, %s3867_s7 }
  0x90   : > { %p3870_p11 = pnand %p3868_p7, %p4333_p2  ;;  %p3875_p3 = por %p3874_p1, %p3873_p13 }
  0x92   : > { %p3871_p12 = pneg %p3870_p11 }
  0x94   : > { %p3876_p4 = pnand %p3875_p3, %p3871_p12 }
  0x96   : > { %3879 = shalt.err (!%p3876_p4)
}
  0x97   : > { %3607 = dma.hbm_to_vmem [thread:$0]  (!%p4317_p0), %s593_s10, 128, %s595_s16, %s583_s25  }
  0x98   : > { %s2895_s29 = sshll.u32 %s4310_s23, 9  ;;  %s3439_s12 = sshll.u32 %s4135_s21, 9 }
  0x99   : > { %s5074_s0 = sld [smem:[#allocation36_spill]]  ;;  %s632_s9 = scalar_lea.vmem [#allocation8], %s2895_s29 }
  0x9a   : > { %s640_s15 = sshll.u32 %s632_s9, 4  ;;  %s641_s15 = int_to_ptr.vmem [resolvable:$true] %s640_s15 }
  0x9f   : > { %s5075_s19 = smov %s5074_s0  ;;  %s637_s20 = scalar_lea.hbm %s5074_s0, %s3439_s12 }
  0xa0   : > { %s638_s18 = sshll.u32 %s637_s20, 4  ;;  %s3902_s16 = scalar_lea.hbm %s5075_s19, 1024  ;;  %s639_s18 = int_to_ptr.hbm [resolvable:$true] %s638_s18 }
  0xa1   : > { %s3895_s4 = sshra.s32 %s639_s18, 4  ;;  %s3896_s4 = int_to_ptr.hbm [resolvable:$true] %s3895_s4 }
  0xa2   : > { %s3897_s7 = scalar_lea.hbm %s3896_s4, 512  ;;  %p3903_p12 = scmp.lt.s32.totalorder %s3896_s4, %s5075_s19 }
  0xa3   : > { %p3898_p6 = scmp.ne.s32.totalorder %s3896_s4, %s3897_s7  ;;  %p3904_p13 = scmp.lt.s32.totalorder %s3902_s16, %s3897_s7 }
  0xa5   : > { %p3900_p7 = pnand %p3898_p6, %p4333_p2  ;;  %p3905_p1 = por %p3904_p13, %p3903_p12 }
  0xa7   : > { %p3901_p11 = pneg %p3900_p7 }
  0xa9   : > { %p3906_p3 = pnand %p3905_p1, %p3901_p11 }
  0xab   : > { %3909 = shalt.err (!%p3906_p3)
}
  0xac   : > { %s5076_s9 = smov 8   ;;  %s5077_s29 = smov 128  }
  0xad   : > { %s5078_s12 = scalar_lea.sflag [#allocation7], %s4322_s28  ;;  %s5038_s24 = sshll.u32 %s4310_s23, 7 }
  0xae   : > { %3613 = dma.hbm_to_vmem [thread:$0]  (!%p4317_p0), %s639_s18, 8192, %s641_s15, %s5078_s12, %s5077_s29, %s5077_s29, %s5076_s9  }
  0xaf   : > { %s5039_s17 = sshll.u32 %s4135_s21, 7  ;;  %s5079_s5 = sld [smem:[#allocation38_spill]] }
  0xb0   : > { %s673_s6 = scalar_lea.vmem [#allocation11], %s5038_s24 }
  0xb1   : > { %s681_s10 = sshll.u32 %s673_s6, 4  ;;  %s682_s10 = int_to_ptr.vmem [resolvable:$true] %s681_s10 }
  0xb5   : > { %s678_s4 = scalar_lea.hbm %s5079_s5, %s5039_s17  ;;  %s3932_s14 = scalar_lea.hbm %s5079_s5, 256 }
  0xb6   : > { %s679_s7 = sshll.u32 %s678_s4, 4  ;;  %s680_s7 = int_to_ptr.hbm [resolvable:$true] %s679_s7 }
  0xb7   : > { %s3925_s16 = sshra.s32 %s680_s7, 4  ;;  %s3926_s16 = int_to_ptr.hbm [resolvable:$true] %s3925_s16 }
  0xb8   : > { %s3927_s25 = scalar_lea.hbm %s3926_s16, 128  ;;  %p3933_p11 = scmp.lt.s32.totalorder %s3926_s16, %s5079_s5 }
  0xb9   : > { %p3928_p4 = scmp.ne.s32.totalorder %s3926_s16, %s3927_s25  ;;  %p3934_p12 = scmp.lt.s32.totalorder %s3932_s14, %s3927_s25 }
  0xbb   : > { %p3930_p6 = pnand %p3928_p4, %p4333_p2  ;;  %p3935_p13 = por %p3934_p12, %p3933_p11 }
  0xbd   : > { %p3931_p7 = pneg %p3930_p6 }
  0xbf   : > { %p3936_p1 = pnand %p3935_p13, %p3931_p7 }
  0xc1   : > { %3939 = shalt.err (!%p3936_p1)
}
  0xc2   : > { %s5041_s20 = smov 64   ;;  %s5042_s4 = smov 4  }
  0xc3   : > { %s5080_s6 = scalar_lea.sflag [#allocation10], %s4322_s28  ;;  %s720_s16 = scalar_lea.hbm %s5009_s8, %s4135_s21 }
  0xc4   : > { %3619 = dma.hbm_to_vmem [thread:$0]  (!%p4317_p0), %s680_s7, 2048, %s682_s10, %s5080_s6, %s5041_s20, %s5041_s20, %s5042_s4  }
  0xc5   : > { %s722_s25 = sshll.u32 %s720_s16, 4  ;;  %s717_s14 = scalar_lea.vmem [#allocation14], %s4310_s23  ;;  %s723_s25 = int_to_ptr.hbm [resolvable:$true] %s722_s25 }
  0xc6   : > { %s724_s12 = sshll.u32 %s717_s14, 4  ;;  %s3955_s0 = sshra.s32 %s723_s25, 4  ;;  %s725_s12 = int_to_ptr.vmem [resolvable:$true] %s724_s12  ;;  %s3956_s0 = int_to_ptr.hbm [resolvable:$true] %s3955_s0 }
  0xc7   : > { %s3957_s24 = scalar_lea.hbm %s3956_s0, 1  ;;  %s3962_s7 = scalar_lea.hbm %s5009_s8, 2 }
  0xc8   : > { %p3958_p3 = scmp.ne.s32.totalorder %s3956_s0, %s3957_s24  ;;  %p3963_p7 = scmp.lt.s32.totalorder %s3956_s0, %s5009_s8 }
  0xc9   : > { %p3964_p11 = scmp.lt.s32.totalorder %s3962_s7, %s3957_s24 }
  0xca   : > { %p3960_p4 = pnand %p3958_p3, %p4333_p2 }
  0xcb   : > { %p3965_p12 = por %p3964_p11, %p3963_p7 }
  0xcc   : > { %p3961_p6 = pneg %p3960_p4 }
  0xce   : > { %p3966_p13 = pnand %p3965_p12, %p3961_p6 }
  0xd0   : > { %3969 = shalt.err (!%p3966_p13)
}
  0xd1   : > { %s5081_s18 = scalar_lea.sflag [#allocation13], %s4322_s28  ;;  %s2904_s15 = sshll.u32 %s4310_s23, 6 }
  0xd2   : > { %3625 = dma.hbm_to_vmem [thread:$0]  (!%p4317_p0), %s723_s25, 16, %s725_s12, %s5081_s18  }
  0xd3   : > { %s3441_s16 = sshll.u32 %s4135_s21, 6  ;;  %s764_s0 = scalar_lea.vmem [#allocation17], %s2904_s15 }
  0xd4   : > { %s769_s14 = scalar_lea.hbm %s5012_s11, %s3441_s16  ;;  %s772_s24 = sshll.u32 %s764_s0, 4  ;;  %s773_s24 = int_to_ptr.vmem [resolvable:$true] %s772_s24 }
  0xd5   : > { %s770_s10 = sshll.u32 %s769_s14, 4  ;;  %s3992_s12 = scalar_lea.hbm %s5012_s11, 128  ;;  %s771_s10 = int_to_ptr.hbm [resolvable:$true] %s770_s10 }
  0xd6   : > { %s3985_s7 = sshra.s32 %s771_s10, 4  ;;  %s3986_s7 = int_to_ptr.hbm [resolvable:$true] %s3985_s7 }
  0xd7   : > { %s3987_s6 = scalar_lea.hbm %s3986_s7, 64  ;;  %p3993_p6 = scmp.lt.s32.totalorder %s3986_s7, %s5012_s11 }
  0xd8   : > { %p3988_p1 = scmp.ne.s32.totalorder %s3986_s7, %s3987_s6  ;;  %p3994_p7 = scmp.lt.s32.totalorder %s3992_s12, %s3987_s6 }
  0xda   : > { %p3990_p3 = pnand %p3988_p1, %p4333_p2  ;;  %p3995_p11 = por %p3994_p7, %p3993_p6 }
  0xdc   : > { %p3991_p4 = pneg %p3990_p3 }
  0xde   : > { %p3996_p12 = pnand %p3995_p11, %p3991_p4 }
  0xe0   : > { %3999 = shalt.err (!%p3996_p12)
}
  0xe1   : > { %s5082_s15 = smov 4   ;;  %s5083_s16 = smov 64  }
  0xe2   : > { %s5084_s2 = scalar_lea.sflag [#allocation16], %s4322_s28  ;;  %s5085_s20 = sshll.u32 %s4135_s21, 7 }
  0xe3   : > { %3631 = dma.hbm_to_vmem [thread:$0]  (!%p4317_p0), %s771_s10, 1024, %s773_s24, %s5084_s2, %s5083_s16, %s5083_s16, %s5082_s15  }
  0xe4   : > { %s797_s14 = scalar_lea.hbm %s5014_s13, %s5085_s20  ;;  %s5086_s0 = sshll.u32 %s4310_s23, 7 }
  0xe5   : > { %s792_s7 = scalar_lea.vmem [#allocation18], %s5086_s0  ;;  %s798_s25 = sshll.u32 %s797_s14, 4  ;;  %s799_s25 = int_to_ptr.hbm [resolvable:$true] %s798_s25 }
  0xe6   : > { %s800_s6 = sshll.u32 %s792_s7, 4  ;;  %s789_s12 = scalar_lea.sflag [#allocation19], %s4322_s28  ;;  %s801_s6 = int_to_ptr.vmem [resolvable:$true] %s800_s6 }
  0xe7   : > { %s4015_s18 = sshra.s32 %s799_s25, 4  ;;  %s4022_s24 = scalar_lea.hbm %s5014_s13, 256  ;;  %s4016_s18 = int_to_ptr.hbm [resolvable:$true] %s4015_s18 }
  0xe8   : > { %s4017_s5 = scalar_lea.hbm %s4016_s18, 128  ;;  %p4023_p4 = scmp.lt.s32.totalorder %s4016_s18, %s5014_s13 }
  0xe9   : > { %p4018_p13 = scmp.ne.s32.totalorder %s4016_s18, %s4017_s5  ;;  %p4024_p6 = scmp.lt.s32.totalorder %s4022_s24, %s4017_s5 }
  0xeb   : > { %p4020_p1 = pnand %p4018_p13, %p4333_p2  ;;  %p4025_p7 = por %p4024_p6, %p4023_p4 }
  0xed   : > { %p4021_p3 = pneg %p4020_p1 }
  0xef   : > { %p4026_p11 = pnand %p4025_p7, %p4021_p3 }
  0xf1   : > { %4029 = shalt.err (!%p4026_p11)
}
  0xf2   : > { %3634 = dma.hbm_to_vmem [thread:$0]  (!%p4317_p0), %s799_s25, 2048, %s801_s6, %s789_s12, %s5077_s29, %s5077_s29, %s5076_s9  }
  0xf3   : > { %812 = sbr.rel (%p4297_p10) target bundleno = 2925 (0xb6d), region = 96  ;;  %s4523_s22 = sand.u32 (!%p4297_p10), 1, %s4127_s30  }
  0xf4   : > { %s2911_s23 = sshll.u32 (!%p4297_p10), %s4523_s22, 3  ;;  %s815_s5 = scalar_lea.sflag (!%p4297_p10), [#allocation4], %s4523_s22 }
  0xf5   : > { %s4527_s28 = scalar_lea.vmem (!%p4297_p10), [#allocation3], %s2911_s23 }
  0xf8   : > { %4090 = dma.done.wait (%p4292_p8), %s815_s5, 128  }
  0xf9   : > { %4092 = vsyncadd (%p4292_p8), %s815_s5, 4294967168  ;;  %s4534_s26 = sand.u32 1, %s4268_s1   ;;  %s2912_s27 = sshll.u32 %s4523_s22, 2 }
  0xfa   : > { %s825_s9 = scalar_lea.sflag [#allocation7], %s4534_s26  ;;  %s4538_s29 = scalar_lea.vmem [#allocation6], %s2912_s27 }
  0xfb   : > { %4094 = dma.done.wait (%p4292_p8), %s825_s9, 8256  }
  0xfc   : > { %4096 = vsyncadd (%p4292_p8), %s825_s9, 4294959040  ;;  %s2913_s2 = sshll.u32 %s4523_s22, 9  ;;  %s2914_s20 = sshll.u32 %s4523_s22, 1 }
  0xfd   : > { %s4546_s17 = scalar_lea.vmem [#allocation8], %s2913_s2  ;;  %s845_s4 = scalar_lea.sflag [#allocation10], %s4534_s26 }
  0xfe   : > { %s4549_s14 = scalar_lea.vmem [#allocation9], %s2914_s20 }
  0xff   : > { %4098 = dma.done.wait (%p4292_p8), %s845_s4, 2080  }
 0x100   : > { %4100 = vsyncadd (%p4292_p8), %s845_s4, 4294965216  ;;  %s2915_s0 = sshll.u32 %s4523_s22, 7  ;;  %s865_s6 = scalar_lea.sflag [#allocation13], %s4534_s26 }
 0x101   : > { %s4556_s7 = scalar_lea.vmem [#allocation11], %s2915_s0  ;;  %s867_s25 = scalar_lea.vmem [#allocation12], %s4523_s22 }
 0x102   : > { %4102 = dma.done.wait (%p4292_p8), %s865_s6, 32  }
 0x103   : > { %4104 = vsyncadd (%p4292_p8), %s865_s6, 4294967264  ;;  %s3569_s12 = smul.u32 192, %s4523_s22  ;;  %s876_s18 = scalar_lea.vmem [#allocation14], %s4523_s22 }
 0x104   : > { %s883_s10 = scalar_lea.sflag [#allocation16], %s4534_s26 }
 0x105   : > { %s4567_s21 = scalar_lea.vmem [#allocation15], %s3569_s12 }
 0x106   : > { %4106 = dma.done.wait (%p4292_p8), %s883_s10, 4096  }
 0x107   : > { %4108 = vsyncadd (%p4292_p8), %s883_s10, 4294963200  ;;  %s2916_s24 = sshll.u32 %s4523_s22, 6  ;;  %s903_s16 = scalar_lea.sflag [#allocation19], %s4534_s26 }
 0x108   : > { %s4574_s15 = scalar_lea.vmem [#allocation17], %s2916_s24  ;;  %s4577_s23 = scalar_lea.vmem [#allocation18], %s2915_s0 }
 0x109   : > { %4110 = dma.done.wait (%p4292_p8), %s903_s16, 2048  }
 0x10a   : > { %4112 = vsyncadd (%p4292_p8), %s903_s16, 4294965248 }
 0x10b   : > { %4114 = dma.done.wait (%p69_p5), [#allocation19], 1024  }
 0x10c   : > { %4116 = vsyncadd (%p69_p5), [#allocation19], 4294966272  ;;  %p1020_p10 = scmp.lt.s32.totalorder %s4268_s1, 1  ;;  %s5087_s2 = sld [smem:[#allocation34_spill]]  ;;  %v1036_v21 = vld [vmem:[%s4527_s28] sm:$0xff]  ;;  %vm1120_vm0 = vcmask 392192  }
 0x10d   : > { %v3030_v25 = vld [vmem:[%s4546_s17 + $0x70] sm:$0xf]  ;;  %v3470_v26 = vld [vmem:[%s4546_s17 + $0x74] sm:$0xf0]  ;;  %v3022_v30 = vld [vmem:[%s4546_s17 + $0x60] sm:$0xf]  ;;  %v4620_v32 = vpack.c.bf16 %v1036_v21, %v1036_v21 }
 0x10e   : > { %s4589_s5 = scalar_select %p1020_p10, %s4268_s1, 1  ;;  %v3031_v29 = vor.u32 %v3470_v26, %v3030_v25  ;;  %v3468_v31 = vld [vmem:[%s4546_s17 + $0x64] sm:$0xf0]  ;;  %v3014_v37 = vld [vmem:[%s4546_s17 + $0x50] sm:$0xf]  ;;  %vm2086_vm5 = vcmask 261120  }
 0x10f   : > { %v3023_v35 = vor.u32 %v3468_v31, %v3022_v30  ;;  %v3466_v38 = vld [vmem:[%s4546_s17 + $0x54] sm:$0xf0]  ;;  %v3094_v44 = vld [vmem:[%s4546_s17 + $0xf0] sm:$0xf]  ;;  %v3006_v50 = vld [vmem:[%s4546_s17 + $0x40] sm:$0xf] }
 0x110   : > { %s3570_s26 = smul.u32 96, %s4589_s5  ;;  %1574 = vmatpush.bf16.msra.mxu0 %v3031_v29  ;;  %v3486_v45 = vld [vmem:[%s4546_s17 + $0xf4] sm:$0xf0]  ;;  %v3158_v46 = vld [vmem:[%s4546_s17 + $0x170] sm:$0xf]  ;;  %v3015_v48 = vor.u32 %v3466_v38, %v3014_v37  ;;  %s5089_s12 = sld [smem:[#allocation42_spill]] }
 0x111   : > { %v3502_v47 = vld [vmem:[%s4546_s17 + $0x174] sm:$0xf0]  ;;  %v3464_v51 = vld [vmem:[%s4546_s17 + $0x44] sm:$0xf0]  ;;  %v3095_v53 = vor.u32 %v3486_v45, %v3094_v44  ;;  %v3222_v54 = vld [vmem:[%s4546_s17 + $0x1f0] sm:$0xf] }
 0x112   : > { %s4595_s20 = scalar_lea.vmem %s5087_s2, %s3570_s26  ;;  %v3518_v55 = vld [vmem:[%s4546_s17 + $0x1f4] sm:$0xf0]  ;;  %v3159_v56 = vor.u32 %v3502_v47, %v3158_v46  ;;  %v3086_v57 = vld [vmem:[%s4546_s17 + $0xe0] sm:$0xf]  ;;  %v3484_v58 = vld [vmem:[%s4546_s17 + $0xe4] sm:$0xf0]  ;;  %v3007_v62 = vor.u32 %v3464_v51, %v3006_v50 }
 0x113   : > { %v2954_v0 = vld [vmem:[%s4595_s20 + $0x40] sm:$0xf]  ;;  %v3453_v1 = vld [vmem:[%s4595_s20 + $0x4c] sm:$0xf0]  ;;  %v2962_v2 = vld [vmem:[%s4595_s20 + $0x48] sm:$0xf]  ;;  %v3223_v59 = vor.u32 %v3518_v55, %v3222_v54 }
 0x114   : > { %v2955_v3 = vor.u32 %v3453_v1, %v2954_v0  ;;  %v3454_v4 = vld [vmem:[%s4595_s20 + $0x54] sm:$0xf0]  ;;  %v2938_v5 = vld [vmem:[%s4595_s20 + $0x20] sm:$0xf]  ;;  %v3449_v6 = vld [vmem:[%s4595_s20 + $0x2c] sm:$0xf0]  ;;  %1575 = vmatpush.bf16.msra.mxu0 %v3023_v35 }
 0x115   : > { %v2963_v7 = vor.u32 %v3454_v4, %v2962_v2  ;;  %v2946_v8 = vld [vmem:[%s4595_s20 + $0x28] sm:$0xf]  ;;  %v3450_v9 = vld [vmem:[%s4595_s20 + $0x34] sm:$0xf0]  ;;  %v2939_v10 = vor.u32 %v3449_v6, %v2938_v5  ;;  %v2922_v12 = vld [vmem:[%s4595_s20] sm:$0xf]  ;;  %1613 = vmatpush.bf16.msra.mxu3 %v3223_v59 }
 0x116   : > { %1129 = vmatpush.bf16.msra.mxu1 %v2955_v3  ;;  %v2947_v11 = vor.u32 %v3450_v9, %v2946_v8  ;;  %v3445_v13 = vld [vmem:[%s4595_s20 + $0xc] sm:$0xf0]  ;;  %v2930_v14 = vld [vmem:[%s4595_s20 + $0x8] sm:$0xf]  ;;  %v3446_v15 = vld [vmem:[%s4595_s20 + $0x14] sm:$0xf0]  ;;  %v3087_v3 = vor.u32 %v3484_v58, %v3086_v57 }
 0x117   : > { %1155 = vmatpush.bf16.msra.mxu2 %v2963_v7  ;;  %v3451_v16 = vld [vmem:[%s4595_s20 + $0x44] sm:$0xf]  ;;  %v2956_v17 = vld [vmem:[%s4595_s20 + $0x50] sm:$0xf0]  ;;  %v3452_v18 = vld [vmem:[%s4595_s20 + $0x4c] sm:$0xf]  ;;  %v2923_v20 = vor.u32 %v3445_v13, %v2922_v12  ;;  %v2931_v22 = vor.u32 %v3446_v15, %v2930_v14 }
 0x118   : > { %v2964_v19 = vld [vmem:[%s4595_s20 + $0x58] sm:$0xf0]  ;;  %v2959_v23 = vor.u32 %v3451_v16, %v2956_v17  ;;  %v3447_v24 = vld [vmem:[%s4595_s20 + $0x24] sm:$0xf]  ;;  %v2940_v28 = vld [vmem:[%s4595_s20 + $0x30] sm:$0xf0]  ;;  %1576 = vmatpush.bf16.msra.mxu0 %v3015_v48 }
 0x119   : > { %v2967_v27 = vor.u32 %v3452_v18, %v2964_v19  ;;  %v3448_v33 = vld [vmem:[%s4595_s20 + $0x2c] sm:$0xf]  ;;  %v2948_v34 = vld [vmem:[%s4595_s20 + $0x38] sm:$0xf0]  ;;  %v2943_v36 = vor.u32 %v3447_v24, %v2940_v28  ;;  %v3443_v40 = vld [vmem:[%s4595_s20 + $0x4] sm:$0xf] }
 0x11a   : > { %1130 = vmatpush.bf16.msra.mxu1 %v2939_v10  ;;  %v2951_v39 = vor.u32 %v3448_v33, %v2948_v34  ;;  %v2924_v41 = vld [vmem:[%s4595_s20 + $0x10] sm:$0xf0]  ;;  %v3444_v42 = vld [vmem:[%s4595_s20 + $0xc] sm:$0xf]  ;;  %v2932_v43 = vld [vmem:[%s4595_s20 + $0x18] sm:$0xf0] }
 0x11b   : > { %1156 = vmatpush.bf16.msra.mxu2 %v2947_v11  ;;  %v2927_v49 = vor.u32 %v3443_v40, %v2924_v41  ;;  %v2935_v52 = vor.u32 %v3444_v42, %v2932_v43  ;;  %v3150_v60 = vld [vmem:[%s4546_s17 + $0x160] sm:$0xf]  ;;  %v3500_v61 = vld [vmem:[%s4546_s17 + $0x164] sm:$0xf0]  ;;  %v2998_v0 = vld [vmem:[%s4546_s17 + $0x30] sm:$0xf] }
 0x11c   : > { %v3214_v63 = vld [vmem:[%s4546_s17 + $0x1e0] sm:$0xf]  ;;  %v3462_v1 = vld [vmem:[%s4546_s17 + $0x34] sm:$0xf0]  ;;  %v3516_v2 = vld [vmem:[%s4546_s17 + $0x1e4] sm:$0xf0]  ;;  %v3151_v5 = vor.u32 %v3500_v61, %v3150_v60  ;;  %1577 = vmatpush.bf16.msra.mxu0 %v3007_v62 }
 0x11d   : > { %v3215_v4 = vor.u32 %v3516_v2, %v3214_v63  ;;  %v3142_v6 = vld [vmem:[%s4546_s17 + $0x150] sm:$0xf]  ;;  %v3482_v8 = vld [vmem:[%s4546_s17 + $0xd4] sm:$0xf0]  ;;  %v2999_v10 = vor.u32 %v3462_v1, %v2998_v0  ;;  %v2990_v13 = vld [vmem:[%s4546_s17 + $0x20] sm:$0xf] }
 0x11e   : > { %1131 = vmatpush.bf16.msra.mxu1 %v2923_v20  ;;  %v3078_v7 = vld [vmem:[%s4546_s17 + $0xd0] sm:$0xf]  ;;  %v3498_v9 = vld [vmem:[%s4546_s17 + $0x154] sm:$0xf0]  ;;  %v3460_v14 = vld [vmem:[%s4546_s17 + $0x24] sm:$0xf0] }
 0x11f   : > { %1157 = vmatpush.bf16.msra.mxu2 %v2931_v22  ;;  %v3206_v11 = vld [vmem:[%s4546_s17 + $0x1d0] sm:$0xf]  ;;  %v3514_v12 = vld [vmem:[%s4546_s17 + $0x1d4] sm:$0xf0]  ;;  %1614 = vmatpush.bf16.msra.mxu3 %v3215_v4  ;;  %v3079_v16 = vor.u32 %v3482_v8, %v3078_v7  ;;  %v3198_v17 = vld [vmem:[%s4546_s17 + $0x1c0] sm:$0xf]  ;;  %v3143_v18 = vor.u32 %v3498_v9, %v3142_v6  ;;  %v2991_v24 = vor.u32 %v3460_v14, %v2990_v13 }
 0x120   : > { %v3207_v15 = vor.u32 %v3514_v12, %v3206_v11  ;;  %v3070_v19 = vld [vmem:[%s4546_s17 + $0xc0] sm:$0xf]  ;;  %v3480_v20 = vld [vmem:[%s4546_s17 + $0xc4] sm:$0xf0]  ;;  %1578 = vmatpush.bf16.msra.mxu0 %v2999_v10  ;;  %v2982_v25 = vld [vmem:[%s4546_s17 + $0x10] sm:$0xf] }
 0x121   : > { %2968 = vmatmul.msk.bf16.vlgmr.msra.gmra.mxu1 %vm1120_vm0, %v4620_v32  ;;  %v3512_v21 = vld [vmem:[%s4546_s17 + $0x1c4] sm:$0xf0]  ;;  %v3134_v22 = vld [vmem:[%s4546_s17 + $0x140] sm:$0xf]  ;;  %v3458_v26 = vld [vmem:[%s4546_s17 + $0x14] sm:$0xf0]  ;;  %v3071_v28 = vor.u32 %v3480_v20, %v3070_v19 }
 0x122   : > { %1142 = vmatpush.bf16.msrb.mxu1 %v2959_v23  ;;  %2970 = vmatmul.msk.bf16.vlgmr.msra.gmra.mxu2 %vm1120_vm0, %v4620_v32  ;;  %v3496_v23 = vld [vmem:[%s4546_s17 + $0x144] sm:$0xf0]  ;;  %v3062_v30 = vld [vmem:[%s4546_s17 + $0xb0] sm:$0xf]  ;;  %v3478_v31 = vld [vmem:[%s4546_s17 + $0xb4] sm:$0xf0]  ;;  %v2983_v35 = vor.u32 %v3458_v26, %v2982_v25 }
 0x123   : > { %1168 = vmatpush.bf16.msrb.mxu2 %v2967_v27  ;;  %1615 = vmatpush.bf16.msra.mxu3 %v3207_v15  ;;  %v3199_v27 = vor.u32 %v3512_v21, %v3198_v17  ;;  %v3135_v29 = vor.u32 %v3496_v23, %v3134_v22  ;;  %v3126_v33 = vld [vmem:[%s4546_s17 + $0x130] sm:$0xf]  ;;  %v3494_v34 = vld [vmem:[%s4546_s17 + $0x134] sm:$0xf0]  ;;  %v3456_v37 = vld [vmem:[%s4546_s17 + $0x4] sm:$0xf0]  ;;  %v3063_v40 = vor.u32 %v3478_v31, %v3062_v30 }
 0x124   : > { %1579 = vmatpush.bf16.msra.mxu0 %v2991_v24  ;;  %v3469_v38 = vld [vmem:[%s4546_s17 + $0x74] sm:$0xf]  ;;  %v3127_v41 = vor.u32 %v3494_v34, %v3126_v33  ;;  %v3476_v42 = vld [vmem:[%s4546_s17 + $0xa4] sm:$0xf0]  ;;  %v3118_v43 = vld [vmem:[%s4546_s17 + $0x120] sm:$0xf] }
 0x125   : > { %v3492_v44 = vld [vmem:[%s4546_s17 + $0x124] sm:$0xf0]  ;;  %v3467_v47 = vld [vmem:[%s4546_s17 + $0x64] sm:$0xf]  ;;  %v3024_v48 = vld [vmem:[%s4546_s17 + $0x68] sm:$0xf0] }
 0x126   : > { %1143 = vmatpush.bf16.msrb.mxu1 %v2943_v36  ;;  %v2974_v36 = vld [vmem:[%s4546_s17] sm:$0xf]  ;;  %v3119_v50 = vor.u32 %v3492_v44, %v3118_v43  ;;  %v3110_v51 = vld [vmem:[%s4546_s17 + $0x110] sm:$0xf]  ;;  %v3501_v57 = vld [vmem:[%s4546_s17 + $0x174] sm:$0xf] }
 0x127   : > { %1169 = vmatpush.bf16.msrb.mxu2 %v2951_v39  ;;  %1616 = vmatpush.bf16.msra.mxu3 %v3199_v27  ;;  %v3032_v39 = vld [vmem:[%s4546_s17 + $0x78] sm:$0xf0]  ;;  %v2975_v45 = vor.u32 %v3456_v37, %v2974_v36  ;;  %v3102_v55 = vld [vmem:[%s4546_s17 + $0x100] sm:$0xf]  ;;  %v3465_v61 = vld [vmem:[%s4546_s17 + $0x54] sm:$0xf] }
 0x128   : > { %1580 = vmatpush.bf16.msra.mxu0 %v2983_v35  ;;  %v3035_v46 = vor.u32 %v3469_v38, %v3032_v39  ;;  %v3160_v58 = vld [vmem:[%s4546_s17 + $0x178] sm:$0xf0]  ;;  %v3190_v0 = vld [vmem:[%s4546_s17 + $0x1b0] sm:$0xf]  ;;  %v3510_v1 = vld [vmem:[%s4546_s17 + $0x1b4] sm:$0xf0] }
 0x129   : > { %v3163_v60 = vor.u32 %v3501_v57, %v3160_v58  ;;  %v3016_v62 = vld [vmem:[%s4546_s17 + $0x58] sm:$0xf0]  ;;  %v3191_v2 = vor.u32 %v3510_v1, %v3190_v0  ;;  %v3152_v4 = vld [vmem:[%s4546_s17 + $0x168] sm:$0xf0]  ;;  %v3046_v6 = vld [vmem:[%s4546_s17 + $0x90] sm:$0xf] }
 0x12a   : > { %1144 = vmatpush.bf16.msrb.mxu1 %v2927_v49  ;;  %v3019_v63 = vor.u32 %v3465_v61, %v3016_v62  ;;  %v3474_v7 = vld [vmem:[%s4546_s17 + $0x94] sm:$0xf0]  ;;  %v3463_v9 = vld [vmem:[%s4546_s17 + $0x44] sm:$0xf]  ;;  %v3008_v10 = vld [vmem:[%s4546_s17 + $0x48] sm:$0xf0] }
 0x12b   : > { %1170 = vmatpush.bf16.msrb.mxu2 %v2935_v52  ;;  %v3490_v52 = vld [vmem:[%s4546_s17 + $0x114] sm:$0xf0]  ;;  %1617 = vmatpush.bf16.msra.mxu3 %v3191_v2  ;;  %v3047_v8 = vor.u32 %v3474_v7, %v3046_v6  ;;  %v3011_v11 = vor.u32 %v3463_v9, %v3008_v10  ;;  %v3182_v12 = vld [vmem:[%s4546_s17 + $0x1a0] sm:$0xf]  ;;  %v3508_v13 = vld [vmem:[%s4546_s17 + $0x1a4] sm:$0xf0] }
 0x12c   : > { %1581 = vmatpush.bf16.msra.mxu0 %v2975_v45  ;;  %v3111_v54 = vor.u32 %v3490_v52, %v3110_v51  ;;  %v3183_v14 = vor.u32 %v3508_v13, %v3182_v12  ;;  %v3497_v15 = vld [vmem:[%s4546_s17 + $0x154] sm:$0xf]  ;;  %v3472_v19 = vld [vmem:[%s4546_s17 + $0x84] sm:$0xf0]  ;;  %v3000_v22 = vld [vmem:[%s4546_s17 + $0x38] sm:$0xf0] }
 0x12d   : > { %v3461_v21 = vld [vmem:[%s4546_s17 + $0x34] sm:$0xf]  ;;  %v3096_v25 = vld [vmem:[%s4546_s17 + $0xf8] sm:$0xf0]  ;;  %v3174_v26 = vld [vmem:[%s4546_s17 + $0x190] sm:$0xf] }
 0x12e   : > { %1587 = vmatpush.bf16.msra.mxu1 %v3095_v53  ;;  %v3027_v53 = vor.u32 %v3467_v47, %v3024_v48  ;;  %v3485_v23 = vld [vmem:[%s4546_s17 + $0xf4] sm:$0xf]  ;;  %v3003_v24 = vor.u32 %v3461_v21, %v3000_v22  ;;  %v3506_v27 = vld [vmem:[%s4546_s17 + $0x194] sm:$0xf0]  ;;  %v3495_v30 = vld [vmem:[%s4546_s17 + $0x144] sm:$0xf] }
 0x12f   : > { %1600 = vmatpush.bf16.msra.mxu2 %v3159_v56  ;;  %v3488_v56 = vld [vmem:[%s4546_s17 + $0x104] sm:$0xf0]  ;;  %1618 = vmatpush.bf16.msra.mxu3 %v3183_v14  ;;  %v3136_v31 = vld [vmem:[%s4546_s17 + $0x148] sm:$0xf0]  ;;  %v3459_v34 = vld [vmem:[%s4546_s17 + $0x24] sm:$0xf] }
 0x130   : > { %1626 = vmatpush.bf16.msrb.mxu0 %v3035_v46  ;;  %v3103_v59 = vor.u32 %v3488_v56, %v3102_v55  ;;  %v3139_v33 = vor.u32 %v3495_v30, %v3136_v31  ;;  %v2992_v35 = vld [vmem:[%s4546_s17 + $0x28] sm:$0xf0]  ;;  %v3483_v36 = vld [vmem:[%s4546_s17 + $0xe4] sm:$0xf]  ;;  %v3166_v39 = vld [vmem:[%s4546_s17 + $0x180] sm:$0xf] }
 0x131   : > { %2969 = vmatmul.msk.bf16.vlgmr.msrb.gmra.mxu1 %vm1120_vm0, %v4620_v32  ;;  %v2995_v37 = vor.u32 %v3459_v34, %v2992_v35  ;;  %v3088_v38 = vld [vmem:[%s4546_s17 + $0xe8] sm:$0xf0]  ;;  %v3128_v43 = vld [vmem:[%s4546_s17 + $0x138] sm:$0xf0]  ;;  %v3517_v44 = vld [vmem:[%s4546_s17 + $0x1f4] sm:$0xf] }
 0x132   : > { %1588 = vmatpush.bf16.msra.mxu1 %v3087_v3  ;;  %2971 = vmatmul.msk.bf16.vlgmr.msrb.gmra.mxu2 %vm1120_vm0, %v4620_v32  ;;  %v3054_v32 = vld [vmem:[%s4546_s17 + $0xa0] sm:$0xf]  ;;  %v3499_v3 = vld [vmem:[%s4546_s17 + $0x164] sm:$0xf]  ;;  %v3224_v46 = vld [vmem:[%s4546_s17 + $0x1f8] sm:$0xf0] }
 0x133   : > { %1601 = vmatpush.bf16.msra.mxu2 %v3151_v5  ;;  %v3055_v49 = vor.u32 %v3476_v42, %v3054_v32  ;;  %v3155_v5 = vor.u32 %v3499_v3, %v3152_v4  ;;  %v3493_v42 = vld [vmem:[%s4546_s17 + $0x134] sm:$0xf]  ;;  %v3227_v47 = vor.u32 %v3517_v44, %v3224_v46  ;;  %v3080_v52 = vld [vmem:[%s4546_s17 + $0xd8] sm:$0xf0]  ;;  %v3120_v55 = vld [vmem:[%s4546_s17 + $0x128] sm:$0xf0] }
 0x134   : > { %1627 = vmatpush.bf16.msrb.mxu0 %v3027_v53  ;;  %v3131_v45 = vor.u32 %v3493_v42, %v3128_v43  ;;  %v3457_v48 = vld [vmem:[%s4546_s17 + $0x14] sm:$0xf]  ;;  %v3515_v56 = vld [vmem:[%s4546_s17 + $0x1e4] sm:$0xf]  ;;  %v3216_v58 = vld [vmem:[%s4546_s17 + $0x1e8] sm:$0xf0] }
 0x135   : > { %v2976_v61 = vld [vmem:[%s4546_s17 + $0x8] sm:$0xf0]  ;;  %v3479_v62 = vld [vmem:[%s4546_s17 + $0xc4] sm:$0xf]  ;;  %v3489_v2 = vld [vmem:[%s4546_s17 + $0x114] sm:$0xf] }
 0x136   : > { %1589 = vmatpush.bf16.msra.mxu1 %v3079_v16  ;;  %v3144_v16 = vld [vmem:[%s4546_s17 + $0x158] sm:$0xf0]  ;;  %v3072_v0 = vld [vmem:[%s4546_s17 + $0xc8] sm:$0xf0]  ;;  %v3513_v4 = vld [vmem:[%s4546_s17 + $0x1d4] sm:$0xf] }
 0x137   : > { %1602 = vmatpush.bf16.msra.mxu2 %v3143_v18  ;;  %v3147_v17 = vor.u32 %v3497_v15, %v3144_v16  ;;  %v3038_v18 = vld [vmem:[%s4546_s17 + $0x80] sm:$0xf]  ;;  %v3075_v1 = vor.u32 %v3479_v62, %v3072_v0  ;;  %v3112_v3 = vld [vmem:[%s4546_s17 + $0x118] sm:$0xf0]  ;;  %v3104_v12 = vld [vmem:[%s4546_s17 + $0x108] sm:$0xf0] }
 0x138   : > { %1628 = vmatpush.bf16.msrb.mxu0 %v3019_v63  ;;  %v3039_v20 = vor.u32 %v3472_v19, %v3038_v18  ;;  %v3208_v6 = vld [vmem:[%s4546_s17 + $0x1d8] sm:$0xf0]  ;;  %v3511_v13 = vld [vmem:[%s4546_s17 + $0x1c4] sm:$0xf]  ;;  %v3200_v15 = vld [vmem:[%s4546_s17 + $0x1c8] sm:$0xf0] }
 0x139   : > { %v3211_v7 = vor.u32 %v3513_v4, %v3208_v6  ;;  %v3064_v9 = vld [vmem:[%s4546_s17 + $0xb8] sm:$0xf0]  ;;  %v3475_v18 = vld [vmem:[%s4546_s17 + $0xa4] sm:$0xf]  ;;  %v3056_v19 = vld [vmem:[%s4546_s17 + $0xa8] sm:$0xf0] }
 0x13a   : > { %1590 = vmatpush.bf16.msra.mxu1 %v3071_v28  ;;  %v3099_v28 = vor.u32 %v3485_v23, %v3096_v25  ;;  %v1050_v16 = vld [vmem:[%s4538_s29] sm:$0xf]  ;;  %v3509_v21 = vld [vmem:[%s4546_s17 + $0x1b4] sm:$0xf]  ;;  %v3471_v30 = vld [vmem:[%s4546_s17 + $0x84] sm:$0xf] }
 0x13b   : > { %1603 = vmatpush.bf16.msra.mxu2 %v3135_v29  ;;  %v3175_v29 = vor.u32 %v3506_v27, %v3174_v26  ;;  %v3192_v22 = vld [vmem:[%s4546_s17 + $0x1b8] sm:$0xf0]  ;;  %v1052_v23 = vperm.slane %v1050_v16, 0  ;;  %v3473_v25 = vld [vmem:[%s4546_s17 + $0x94] sm:$0xf]  ;;  %s5088_s29 = sld [smem:[#allocation39_spill]] }
 0x13c   : > { %1629 = vmatpush.bf16.msrb.mxu0 %v3011_v11  ;;  %v3487_v11 = vld [vmem:[%s4546_s17 + $0x104] sm:$0xf]  ;;  %v3048_v26 = vld [vmem:[%s4546_s17 + $0x98] sm:$0xf0]  ;;  %v3040_v34 = vld [vmem:[%s4546_s17 + $0x88] sm:$0xf0] }
 0x13d   : > { %1619 = vmatpush.bf16.msra.mxu3 %v3175_v29  ;;  %v3107_v14 = vor.u32 %v3487_v11, %v3104_v12  ;;  %v3051_v27 = vor.u32 %v3473_v25, %v3048_v26  ;;  %v3184_v29 = vld [vmem:[%s4546_s17 + $0x1a8] sm:$0xf0]  ;;  %v3503_v43 = vld [vmem:[%s4546_s17 + $0x184] sm:$0xf]  ;;  %v3525_v0 = vld [vmem:[%s4556_s7 + $0x30] sm:$0xff]  ;;  %s3571_s0 = smul.u32 3, %s4589_s5 }
 0x13e   : > { %1591 = vmatpush.bf16.msra.mxu1 %v3063_v40  ;;  %v3504_v40 = vld [vmem:[%s4546_s17 + $0x184] sm:$0xf0]  ;;  %v3168_v44 = vld [vmem:[%s4546_s17 + $0x188] sm:$0xf0]  ;;  %v3534_v4 = vld [vmem:[%s4556_s7 + $0x78] sm:$0xff]  ;;  %s4145_s22 = smov 96  }
 0x13f   : > { %1604 = vmatpush.bf16.msra.mxu2 %v3127_v41  ;;  %v3091_v41 = vor.u32 %v3483_v36, %v3088_v38  ;;  %v3167_v32 = vor.u32 %v3504_v40, %v3166_v39  ;;  %v3505_v36 = vld [vmem:[%s4546_s17 + $0x194] sm:$0xf]  ;;  %v3043_v38 = vor.u32 %v3471_v30, %v3040_v34  ;;  %v1054_v40 = vperm.slane %v1050_v16, 2  ;;  %v3530_v12 = vld [vmem:[%s4556_s7 + $0x58] sm:$0xff]  ;;  %s1031_s10 = scalar_lea.vmem %s5089_s12, %s3571_s0  ;;  %s5090_s16 = sld [smem:[#allocation43_spill]] }
 0x140   : > { %1630 = vmatpush.bf16.msrb.mxu0 %v3003_v24  ;;  %v3195_v24 = vor.u32 %v3509_v21, %v3192_v22  ;;  %v3533_v6 = vld [vmem:[%s4556_s7 + $0x70] sm:$0xff]  ;;  %vm2113_vm6 = vcmask 64512   ;;  %vm2357_vm7 = vcmask 523264   ;;  %vm2359_vm8 = vcmask 785408   ;;  %s5091_s27 = sld [smem:[#allocation44_spill]] (!%p2889_p9) }
 0x141   : > { %1620 = vmatpush.bf16.msra.mxu3 %v3167_v32 }
 0x142   : > { %1592 = vmatpush.bf16.msra.mxu1 %v3055_v49  ;;  %v2984_v49 = vld [vmem:[%s4546_s17 + $0x18] sm:$0xf0] }
 0x143   : > { %1605 = vmatpush.bf16.msra.mxu2 %v3119_v50  ;;  %v3481_v50 = vld [vmem:[%s4546_s17 + $0xd4] sm:$0xf]  ;;  %v2987_v51 = vor.u32 %v3457_v48, %v2984_v49 }
 0x144   : > { %1631 = vmatpush.bf16.msrb.mxu0 %v2995_v37  ;;  %v3083_v53 = vor.u32 %v3481_v50, %v3080_v52  ;;  %v3176_v37 = vld [vmem:[%s4546_s17 + $0x198] sm:$0xf0]  ;;  %v1053_v50 = vperm.slane %v1050_v16, 1 }
 0x145   : > { %1665 = vmatpush.bf16.msrb.mxu3 %v3227_v47  ;;  %v3171_v47 = vor.u32 %v3503_v43, %v3168_v44  ;;  %s1034_s26 = scalar_lea.vmem %s5090_s16, %s4589_s5 }
 0x146   : > { %1593 = vmatpush.bf16.msra.mxu1 %v3047_v8  ;;  %v3477_v8 = vld [vmem:[%s4546_s17 + $0xb4] sm:$0xf] }
 0x147   : > { %1606 = vmatpush.bf16.msra.mxu2 %v3111_v54  ;;  %v3491_v54 = vld [vmem:[%s4546_s17 + $0x124] sm:$0xf]  ;;  %v3067_v10 = vor.u32 %v3477_v8, %v3064_v9  ;;  %v3532_v8 = vld [vmem:[%s4556_s7 + $0x68] sm:$0xff] }
 0x148   : > { %1632 = vmatpush.bf16.msrb.mxu0 %v2987_v51  ;;  %v3123_v57 = vor.u32 %v3491_v54, %v3120_v55  ;;  %v1055_v55 = vperm.slane %v1050_v16, 3  ;;  %v3519_v9 = vld [vmem:[%s4556_s7] sm:$0xff] }
 0x14a   : > { %1594 = vmatpush.bf16.msra.mxu1 %v3039_v20  ;;  %v3059_v20 = vor.u32 %v3475_v18, %v3056_v19  ;;  %v3527_v18 = vld [vmem:[%s4556_s7 + $0x40] sm:$0xff] }
 0x14b   : > { %1607 = vmatpush.bf16.msra.mxu2 %v3103_v59  ;;  %v3219_v59 = vor.u32 %v3515_v56, %v3216_v58 }
 0x14d   : > { %1666 = vmatpush.bf16.msrb.mxu3 %v3219_v59 }
 0x14e   : > { %1639 = vmatpush.bf16.msrb.mxu1 %v3099_v28  ;;  %v3507_v28 = vld [vmem:[%s4546_s17 + $0x1a4] sm:$0xf] }
 0x14f   : > { %1652 = vmatpush.bf16.msrb.mxu2 %v3163_v60  ;;  %v3455_v60 = vld [vmem:[%s4546_s17 + $0x4] sm:$0xf]  ;;  %s1027_s17 = scalar_lea.vmem %s5088_s29, %s4589_s5 }
 0x150   : > { %v2979_v63 = vor.u32 %v3455_v60, %v2976_v61 }
 0x151   : > { %1667 = vmatpush.bf16.msrb.mxu3 %v3211_v7  ;;  %v3520_v7 = vld [vmem:[%s4556_s7 + $0x8] sm:$0xff] }
 0x152   : > { %1640 = vmatpush.bf16.msrb.mxu1 %v3091_v41  ;;  %1633 = vmatpush.bf16.msrb.mxu0 %v2979_v63  ;;  %v3179_v41 = vor.u32 %v3505_v36, %v3176_v37  ;;  %v3526_v63 = vld [vmem:[%s4556_s7 + $0x38] sm:$0xff] }
 0x153   : > { %1653 = vmatpush.bf16.msrb.mxu2 %v3155_v5  ;;  %v3115_v5 = vor.u32 %v3489_v2, %v3112_v3  ;;  %v3523_v2 = vld [vmem:[%s4556_s7 + $0x20] sm:$0xff]  ;;  %v3522_v3 = vld [vmem:[%s4556_s7 + $0x18] sm:$0xff] }
 0x156   : > { %1641 = vmatpush.bf16.msrb.mxu1 %v3083_v53 }
 0x157   : > { %1654 = vmatpush.bf16.msrb.mxu2 %v3147_v17  ;;  %v3203_v17 = vor.u32 %v3511_v13, %v3200_v15  ;;  %v3529_v13 = vld [vmem:[%s4556_s7 + $0x50] sm:$0xff]  ;;  %v3528_v15 = vld [vmem:[%s4556_s7 + $0x48] sm:$0xff] }
 0x159   : > { %1668 = vmatpush.bf16.msrb.mxu3 %v3203_v17  ;;  %v1248_v17 = vld [vmem:[%s4549_s14] sm:$0x3] }
 0x15a   : > { %1642 = vmatpush.bf16.msrb.mxu1 %v3075_v1  ;;  %v3524_v1 = vld [vmem:[%s4556_s7 + $0x28] sm:$0xff]  ;;  %v1250_v21 = vperm.slane %v1248_v17, 0  ;;  %v1251_v34 = vperm.slane %v1248_v17, 1 }
 0x15b   : > { %1655 = vmatpush.bf16.msrb.mxu2 %v3139_v33  ;;  %v3187_v33 = vor.u32 %v3507_v28, %v3184_v29 }
 0x15d   : > { %1669 = vmatpush.bf16.msrb.mxu3 %v3195_v24 }
 0x15e   : > { %1643 = vmatpush.bf16.msrb.mxu1 %v3067_v10  ;;  %v3531_v10 = vld [vmem:[%s4556_s7 + $0x60] sm:$0xff] }
 0x15f   : > { %1656 = vmatpush.bf16.msrb.mxu2 %v3131_v45 }
 0x161   : > { %1670 = vmatpush.bf16.msrb.mxu3 %v3187_v33 }
 0x162   : > { %1644 = vmatpush.bf16.msrb.mxu1 %v3059_v20 }
 0x163   : > { %1657 = vmatpush.bf16.msrb.mxu2 %v3123_v57 }
 0x165   : > { %1671 = vmatpush.bf16.msrb.mxu3 %v3179_v41 }
 0x166   : > { %1645 = vmatpush.bf16.msrb.mxu1 %v3051_v27 }
 0x167   : > { %1658 = vmatpush.bf16.msrb.mxu2 %v3115_v5  ;;  %v3521_v5 = vld [vmem:[%s4556_s7 + $0x10] sm:$0xff] }
 0x169   : > { %1672 = vmatpush.bf16.msrb.mxu3 %v3171_v47 }
 0x16a   : > { %1646 = vmatpush.bf16.msrb.mxu1 %v3043_v38 }
 0x16b   : > { %1659 = vmatpush.bf16.msrb.mxu2 %v3107_v14 }
 0x19e   : > { %v1133_v31 = vpop.f32.mrf.mxu1 }
 0x19f   : > { %v1134_v35 = vadd.f32 %v1133_v31, %v1052_v23 }
 0x1a1   : > { %v1176_v39 = vmax.f32 %v1134_v35, 0.0 }
 0x1a3   : > { %v1180_v32 = vpack.c.bf16 %v1176_v39, %v1176_v39 }
 0x1a5   : > { %v1159_v42 = vpop.f32.mrf.mxu2  ;;  %1582 = vmatmul.bf16.vlgmr.msra.gmra.mxu0 %v1180_v32 }
 0x1a6   : > { %v1160_v45 = vadd.f32 %v1159_v42, %v1054_v40  ;;  %v1135_v46 = vpop.f32.mrf.mxu1  ;;  %1814 = vmatpush.bf16.msra.mxu0 %v3526_v63 }
 0x1a8   : > { %v1178_v48 = vmax.f32 %v1160_v45, 0.0 }
 0x1aa   : > { %v1182_v49 = vpack.c.bf16 %v1178_v48, %v1178_v48  ;;  %1815 = vmatpush.bf16.msra.mxu0 %v3525_v0  ;;  %v3684_v48 = vld [vmem:[%s1027_s17] ss:$0 sm:$0xff] }
 0x1ac   : > { %1608 = vmatmul.bf16.vlgmr.msra.gmra.mxu2 %v1182_v49 }
 0x1ad   : > { %v1161_v51 = vpop.f32.mrf.mxu2 }
 0x1ae   : > { %v1146_v52 = vpop.f32.mrf.mxu1  ;;  %1816 = vmatpush.bf16.msra.mxu0 %v3524_v1 }
 0x1af   : > { %v1147_v53 = vadd.f32 %v1146_v52, %v1053_v50 }
 0x1b1   : > { %v1177_v54 = vmax.f32 %v1147_v53, 0.0 }
 0x1b2   : > { %1817 = vmatpush.bf16.msra.mxu0 %v3523_v2 }
 0x1b3   : > { %v1181_v56 = vpack.c.bf16 %v1177_v54, %v1177_v54  ;;  %v4144_v54 = vmov 128.0  }
 0x1b4   : > { %3688 = vrcp.f32 %v4144_v54 }
 0x1b5   : > { %v1172_v57 = vpop.f32.mrf.mxu2  ;;  %1595 = vmatmul.bf16.vlgmr.msra.gmra.mxu1 %v1181_v56  ;;  %1634 = vmatmul.bf16.vlgmr.msrb.gmra.mxu0 %v1180_v32 }
 0x1b6   : > { %v1173_v58 = vadd.f32 %v1172_v57, %v1055_v55  ;;  %v1148_v59 = vpop.f32.mrf.mxu1  ;;  %1818 = vmatpush.bf16.msra.mxu0 %v3522_v3  ;;  %1827 = vmatpush.bf16.msra.mxu1 %v3534_v4  ;;  %v3378_v55 = vld [vmem:[%s4567_s21 + $0xa8] sm:$0xf]  ;;  %v3556_v57 = vld [vmem:[%s4567_s21 + $0xac] sm:$0xf] }
 0x1b7   : > { %v3380_v59 = vld [vmem:[%s4567_s21 + $0xb4] sm:$0xf0] }
 0x1b8   : > { %v1179_v60 = vmax.f32 %v1173_v58, 0.0 }
 0x1ba   : > { %v1183_v61 = vpack.c.bf16 %v1179_v60, %v1179_v60  ;;  %1819 = vmatpush.bf16.msra.mxu0 %v3521_v5  ;;  %1828 = vmatpush.bf16.msra.mxu1 %v3533_v6  ;;  %v3386_v60 = vld [vmem:[%s4567_s21 + $0xb0] sm:$0xf]  ;;  %v3689_v0 = vpop.eup %3688 }
 0x1bb   : > { %v1844_v1 = vmul.f32 128.0, %v3689_v0  ;;  %vm1848_vm1 = vweird.f32 %v3689_v0 }
 0x1bc   : > { %1621 = vmatmul.bf16.vlgmr.msra.gmra.mxu3 %v1183_v61  ;;  %1660 = vmatmul.bf16.vlgmr.msrb.gmra.mxu2 %v1182_v49 }
 0x1bd   : > { %v1174_v62 = vpop.f32.mrf.mxu2  ;;  %v1845_v2 = vsub.f32 1.0, %v1844_v1  ;;  %v3536_v1 = vld [vmem:[%s4567_s21 + $0x8] sm:$0xf0] }
 0x1be   : > { %1820 = vmatpush.bf16.msra.mxu0 %v3520_v7  ;;  %1829 = vmatpush.bf16.msra.mxu1 %v3532_v8  ;;  %v3383_v62 = vor.u32 %v3556_v57, %v3380_v59  ;;  %v3538_v57 = vld [vmem:[%s4567_s21 + $0x1c] sm:$0xf]  ;;  %v3308_v59 = vld [vmem:[%s4567_s21 + $0x24] sm:$0xf0] }
 0x1bf   : > { %v1846_v3 = vmul.f32 %v3689_v0, %v1845_v2  ;;  %v3535_v2 = vld [vmem:[%s4567_s21 + $0x4] sm:$0xf] }
 0x1c0   : > { %2060 = vmatpush.bf16.msra.mxu3 %v3383_v62  ;;  %v3311_v62 = vor.u32 %v3538_v57, %v3308_v59 }
 0x1c1   : > { %v1847_v4 = vadd.f32 %v3689_v0, %v1846_v3 }
 0x1c2   : > { %1821 = vmatpush.bf16.msra.mxu0 %v3519_v9  ;;  %1830 = vmatpush.bf16.msra.mxu1 %v3531_v10  ;;  %v3366_v10 = vld [vmem:[%s4567_s21 + $0x90] sm:$0xf] }
 0x1c3   : > { %v4793_v5 = vsel %vm1848_vm1, %v3689_v0, %v1847_v4  ;;  %v3294_v0 = vld [vmem:[%s4567_s21] sm:$0xf]  ;;  %v3296_v4 = vld [vmem:[%s4567_s21 + $0xc] sm:$0xf0] }
 0x1c4   : > { %v3295_v3 = vor.u32 %v3536_v1, %v3294_v0 }
 0x1c5   : > { %1647 = vmatmul.bf16.vlgmr.msrb.gmra.mxu1 %v1181_v56  ;;  %v3557_v56 = vld [vmem:[%s4567_s21 + $0xb0] sm:$0xf0] }
 0x1c6   : > { %1831 = vmatpush.bf16.msra.mxu1 %v3530_v12  ;;  %v3379_v58 = vor.u32 %v3557_v56, %v3378_v55  ;;  %v3553_v12 = vld [vmem:[%s4567_s21 + $0x94] sm:$0xf]  ;;  %v3306_v55 = vld [vmem:[%s4567_s21 + $0x18] sm:$0xf]  ;;  %v3539_v56 = vld [vmem:[%s4567_s21 + $0x20] sm:$0xf0] }
 0x1c8   : > { %2047 = vmatpush.bf16.msra.mxu2 %v3379_v58  ;;  %v3307_v58 = vor.u32 %v3539_v56, %v3306_v55 }
 0x1ca   : > { %1832 = vmatpush.bf16.msra.mxu1 %v3529_v13 }
 0x1cc   : > { %1673 = vmatmul.bf16.vlgmr.msrb.gmra.mxu3 %v1183_v61  ;;  %v3558_v61 = vld [vmem:[%s4567_s21 + $0xb8] sm:$0xf0] }
 0x1cd   : > { %v3387_v63 = vor.u32 %v3558_v61, %v3386_v60  ;;  %v3314_v60 = vld [vmem:[%s4567_s21 + $0x20] sm:$0xf]  ;;  %v3540_v61 = vld [vmem:[%s4567_s21 + $0x28] sm:$0xf0] }
 0x1ce   : > { %1833 = vmatpush.bf16.msra.mxu1 %v3528_v15  ;;  %v3374_v15 = vld [vmem:[%s4567_s21 + $0x98] sm:$0xf] }
 0x1cf   : > { %2073 = vmatpush.bf16.msrb.mxu0 %v3387_v63  ;;  %v3315_v63 = vor.u32 %v3540_v61, %v3314_v60 }
 0x1d2   : > { %1834 = vmatpush.bf16.msra.mxu1 %v3527_v18 }
 0x222   : > { %v1583_v11 = vpop.f32.mrf.mxu0 }
 0x223   : > { %v1584_v23 = vadd.f32 %v1583_v11, %v1250_v21  ;;  %v3554_v11 = vld [vmem:[%s4567_s21 + $0x98] sm:$0xf0] }
 0x224   : > { %v3367_v13 = vor.u32 %v3554_v11, %v3366_v10  ;;  %v3550_v21 = vld [vmem:[%s4567_s21 + $0x7c] sm:$0xf] }
 0x226   : > { %2048 = vmatpush.bf16.msra.mxu2 %v3367_v13 }
 0x22a   : > { %v1585_v14 = vpop.f32.mrf.mxu0 }
 0x22b   : > { %v3368_v14 = vld [vmem:[%s4567_s21 + $0x9c] sm:$0xf0] }
 0x22c   : > { %v3371_v17 = vor.u32 %v3553_v12, %v3368_v14 }
 0x22e   : > { %2061 = vmatpush.bf16.msra.mxu3 %v3371_v17 }
 0x22f   : > { %v1609_v16 = vpop.f32.mrf.mxu2 }
 0x232   : > { %v1596_v19 = vpop.f32.mrf.mxu1  ;;  %v1635_v20 = vpop.f32.mrf.mxu0 }
 0x233   : > { %v1597_v24 = vadd.f32 %v1596_v19, %v1584_v23  ;;  %v1636_v38 = vadd.f32 %v1635_v20, %v1251_v34  ;;  %v3354_v19 = vld [vmem:[%s4567_s21 + $0x78] sm:$0xf]  ;;  %v3551_v20 = vld [vmem:[%s4567_s21 + $0x80] sm:$0xf0]  ;;  %v3356_v23 = vld [vmem:[%s4567_s21 + $0x84] sm:$0xf0] }
 0x234   : > { %v3350_v34 = vld [vmem:[%s4567_s21 + $0x68] sm:$0xf] }
 0x235   : > { %v1610_v27 = vadd.f32 %v1609_v16, %v1597_v24  ;;  %v3555_v16 = vld [vmem:[%s4567_s21 + $0xa0] sm:$0xf0]  ;;  %v3362_v24 = vld [vmem:[%s4567_s21 + $0x80] sm:$0xf] }
 0x236   : > { %v3375_v18 = vor.u32 %v3555_v16, %v3374_v15 }
 0x237   : > { %v1611_v22 = vpop.f32.mrf.mxu2 }
 0x238   : > { %2074 = vmatpush.bf16.msrb.mxu0 %v3375_v18  ;;  %v3355_v22 = vor.u32 %v3551_v20, %v3354_v19  ;;  %v3685_v20 = vld [vmem:[%s867_s25] ss:$0 sm:$0xff]  ;;  %s4146_s25 = smov 64  }
 0x23a   : > { %v1598_v25 = vpop.f32.mrf.mxu1  ;;  %v1637_v26 = vpop.f32.mrf.mxu0  ;;  %2049 = vmatpush.bf16.msra.mxu2 %v3355_v22 }
 0x23b   : > { %v3552_v25 = vld [vmem:[%s4567_s21 + $0x88] sm:$0xf0]  ;;  %v3359_v26 = vor.u32 %v3550_v21, %v3356_v23  ;;  %v3686_v23 = vld [vmem:[%s876_s18] ss:$0 sm:$0xff]  ;;  %s4147_s18 = smov 32  }
 0x23d   : > { %2062 = vmatpush.bf16.msra.mxu3 %v3359_v26  ;;  %v1911_v26 = vld [vmem:[%s1031_s10] sm:$0x7] }
 0x23f   : > { %v1622_v28 = vpop.f32.mrf.mxu3  ;;  %v1661_v29 = vpop.f32.mrf.mxu2 }
 0x240   : > { %v1623_v30 = vadd.f32 %v1622_v28, %v1610_v27  ;;  %v3363_v27 = vor.u32 %v3552_v25, %v3362_v24  ;;  %v3342_v28 = vld [vmem:[%s4567_s21 + $0x60] sm:$0xf] }
 0x242   : > { %v1678_v31 = vmax.f32 %v1623_v30, 0.0  ;;  %v1648_v33 = vpop.f32.mrf.mxu1  ;;  %2075 = vmatpush.bf16.msrb.mxu0 %v3363_v27  ;;  %v3547_v30 = vld [vmem:[%s4567_s21 + $0x64] sm:$0xf]  ;;  %v1915_v27 = vperm.slane %v1911_v26, 2 }
 0x243   : > { %v1649_v39 = vadd.f32 %v1648_v33, %v1636_v38  ;;  %v3344_v33 = vld [vmem:[%s4567_s21 + $0x6c] sm:$0xf0]  ;;  %v3330_v38 = vld [vmem:[%s4567_s21 + $0x48] sm:$0xf] }
 0x244   : > { %v1680_v35 = vpack.c.bf16 %v1678_v31, %v1678_v31 }
 0x245   : > { %v1662_v41 = vadd.f32 %v1661_v29, %v1649_v39  ;;  %v3548_v29 = vld [vmem:[%s4567_s21 + $0x68] sm:$0xf0]  ;;  %v3545_v39 = vld [vmem:[%s4567_s21 + $0x50] sm:$0xf0] }
 0x246   : > { %1822 = vmatmul.bf16.vlgmr.msra.gmra.mxu0 %v1680_v35  ;;  %v3343_v31 = vor.u32 %v3548_v29, %v3342_v28  ;;  %v3549_v35 = vld [vmem:[%s4567_s21 + $0x70] sm:$0xf0] }
 0x247   : > { %v1624_v36 = vpop.f32.mrf.mxu3  ;;  %v1663_v37 = vpop.f32.mrf.mxu2 }
 0x248   : > { %v3347_v36 = vor.u32 %v3547_v30, %v3344_v33  ;;  %v3351_v37 = vor.u32 %v3549_v35, %v3350_v34  ;;  %2050 = vmatpush.bf16.msra.mxu2 %v3343_v31  ;;  %v1914_v30 = vperm.slane %v1911_v26, 1 }
 0x24a   : > { %v1650_v40 = vpop.f32.mrf.mxu1  ;;  %2063 = vmatpush.bf16.msra.mxu3 %v3347_v36  ;;  %2076 = vmatpush.bf16.msrb.mxu0 %v3351_v37 }
 0x24b   : > { %v3544_v40 = vld [vmem:[%s4567_s21 + $0x4c] sm:$0xf] }
 0x24f   : > { %v1674_v32 = vpop.f32.mrf.mxu3 }
 0x250   : > { %v1675_v42 = vadd.f32 %v1674_v32, %v1662_v41  ;;  %v3331_v41 = vor.u32 %v3545_v39, %v3330_v38  ;;  %v3332_v32 = vld [vmem:[%s4567_s21 + $0x54] sm:$0xf0] }
 0x252   : > { %v1679_v43 = vmax.f32 %v1675_v42, 0.0  ;;  %v3338_v42 = vld [vmem:[%s4567_s21 + $0x50] sm:$0xf]  ;;  %2051 = vmatpush.bf16.msra.mxu2 %v3331_v41 }
 0x254   : > { %v1681_v44 = vpack.c.bf16 %v1679_v43, %v1679_v43  ;;  %v3546_v43 = vld [vmem:[%s4567_s21 + $0x58] sm:$0xf0] }
 0x256   : > { %1835 = vmatmul.bf16.vlgmr.msra.gmra.mxu1 %v1681_v44  ;;  %v3335_v44 = vor.u32 %v3544_v40, %v3332_v32 }
 0x257   : > { %v1676_v45 = vpop.f32.mrf.mxu3 }
 0x258   : > { %v3339_v45 = vor.u32 %v3546_v43, %v3338_v42  ;;  %2064 = vmatpush.bf16.msra.mxu3 %v3335_v44 }
 0x25a   : > { %2077 = vmatpush.bf16.msrb.mxu0 %v3339_v45 }
 0x2c3   : > { %v1823_v46 = vpop.f32.mrf.mxu0 }
 0x2c4   : > { %v1824_v49 = vadd.f32 %v3684_v48, %v1823_v46  ;;  %v3318_v46 = vld [vmem:[%s4567_s21 + $0x30] sm:$0xf]  ;;  %v3541_v48 = vld [vmem:[%s4567_s21 + $0x34] sm:$0xf] }
 0x2cb   : > { %v1825_v47 = vpop.f32.mrf.mxu0 }
 0x2cc   : > { %v3542_v47 = vld [vmem:[%s4567_s21 + $0x38] sm:$0xf0] }
 0x2d3   : > { %v1836_v50 = vpop.f32.mrf.mxu1 }
 0x2d4   : > { %v1837_v51 = vadd.f32 %v1836_v50, %v1824_v49  ;;  %v3319_v49 = vor.u32 %v3542_v47, %v3318_v46  ;;  %v3320_v50 = vld [vmem:[%s4567_s21 + $0x3c] sm:$0xf0] }
 0x2d6   : > { %v1840_v52 = vmax.f32 %v1837_v51, 0.0  ;;  %v3326_v51 = vld [vmem:[%s4567_s21 + $0x38] sm:$0xf]  ;;  %2052 = vmatpush.bf16.msra.mxu2 %v3319_v49 }
 0x2d8   : > { %1841 = vadd.xlane.f32.xlu0 %v1840_v52 }
 0x2da   : > { %2053 = vmatpush.bf16.msra.mxu2 %v3307_v58 }
 0x2db   : > { %v1838_v53 = vpop.f32.mrf.mxu1 }
 0x2dc   : > { %v3323_v53 = vor.u32 %v3541_v48, %v3320_v50 }
 0x2de   : > { %2065 = vmatpush.bf16.msra.mxu3 %v3323_v53  ;;  %2054 = vmatpush.bf16.msra.mxu2 %v3295_v3 }
 0x2e2   : > { %2066 = vmatpush.bf16.msra.mxu3 %v3311_v62 }
 0x34b   : > { %v1842_v6 = vpop.xlane.xlu0 %1841 }
 0x34c   : > { %v1850_v7 = vmul.f32 %v4793_v5, %v1842_v6  ;;  %v3302_v6 = vld [vmem:[%s4567_s21 + $0x8] sm:$0xf] }
 0x34e   : > { %v4796_v8 = vsub.f32 %v1840_v52, %v1850_v7  ;;  %v3543_v52 = vld [vmem:[%s4567_s21 + $0x40] sm:$0xf0]  ;;  %v3537_v7 = vld [vmem:[%s4567_s21 + $0x10] sm:$0xf0] }
 0x34f   : > { %v3327_v54 = vor.u32 %v3543_v52, %v3326_v51  ;;  %v3303_v10 = vor.u32 %v3537_v7, %v3302_v6 }
 0x350   : > { %v1852_v9 = vmul.f32 %v4796_v8, %v4796_v8 }
 0x351   : > { %2078 = vmatpush.bf16.msrb.mxu0 %v3327_v54 }
 0x352   : > { %1853 = vadd.xlane.f32.xlu0 %v1852_v9  ;;  %v3299_v9 = vor.u32 %v3535_v2, %v3296_v4 }
 0x354   : > { %2067 = vmatpush.bf16.msra.mxu3 %v3299_v9 }
 0x355   : > { %2079 = vmatpush.bf16.msrb.mxu0 %v3315_v63 }
 0x359   : > { %2080 = vmatpush.bf16.msrb.mxu0 %v3303_v10 }
 0x3c5   : > { %v1854_v11 = vpop.xlane.xlu0 %1853 }
 0x3c6   : > { %v1855_v12 = vmul.f32 %v1854_v11, %v4793_v5 }
 0x3c8   : > { %v1856_v13 = vadd.f32 1e-05, %v1855_v12 }
 0x3ca   : > { %3690 = vrsqrt.f32 %v1856_v13  ;;  %vm1863_vm3 = vweird.f32 %v1856_v13 }
 0x3d0   : > { %v3691_v14 = vpop.eup %3690 }
 0x3d1   : > { %v1858_v15 = vmul.f32 %v3691_v14, %v1856_v13  ;;  %vm1864_vm2 = vweird.f32 %v3691_v14 }
 0x3d2   : > { %vm1865_vm4 = vmor %vm1863_vm3, %vm1864_vm2 }
 0x3d3   : > { %v1859_v16 = vmul.f32 %v3691_v14, %v1858_v15 }
 0x3d5   : > { %v1860_v17 = vmul.f32 0.5, %v1859_v16 }
 0x3d7   : > { %v1861_v18 = vsub.f32 1.5, %v1860_v17 }
 0x3d9   : > { %v1862_v19 = vmul.f32 %v3691_v14, %v1861_v18 }
 0x3db   : > { %v1866_v21 = vsel %vm1865_vm4, %v3691_v14, %v1862_v19 }
 0x3dc   : > { %v1867_v22 = vmul.f32 %v1866_v21, %v4796_v8  ;;  %v1913_v8 = vperm.slane %v1911_v26, 0  ;;  %v3566_v26 = vld [vmem:[%s4574_s15 + $0x38] sm:$0xff] }
 0x3de   : > { %v1872_v5 = vmul.f32 %v3685_v20, %v1867_v22 }
 0x3e0   : > { %v1877_v24 = vadd.f32 %v3686_v23, %v1872_v5 }
 0x3e2   : > { %v1878_v25 = vpack.c.bf16 %v1877_v24, %v1877_v24 }
 0x3e4   : > { %2055 = vmatmul.bf16.vlgmr.msra.gmra.mxu2 %v1878_v25  ;;  %2068 = vmatmul.bf16.vlgmr.msra.gmra.mxu3 %v1878_v25 }
 0x3e5   : > { %2081 = vmatmul.bf16.vlgmr.msrb.gmra.mxu0 %v1878_v25 }
 0x462   : > { %v2082_v28 = vpop.f32.mrf.mxu0 }
 0x463   : > { %v4852_v29 = vadd.f32 %v2082_v28, %v1915_v27  ;;  %v3565_v27 = vld [vmem:[%s4574_s15 + $0x30] sm:$0xff]  ;;  %v3564_v28 = vld [vmem:[%s4574_s15 + $0x28] sm:$0xff] }
 0x465   : > { %2143 = vmatpush.msrb.mxu2 %v4852_v29 }
 0x467   : > { %v2056_v31 = vpop.f32.mrf.mxu2  ;;  %v2069_v33 = vpop.f32.mrf.mxu3 }
 0x468   : > { %v2070_v34 = vadd.f32 %v2069_v33, %v1914_v30  ;;  %v2057_v36 = vadd.f32 %v2056_v31, %v1913_v8  ;;  %v3562_v30 = vld [vmem:[%s4574_s15 + $0x18] sm:$0xff]  ;;  %v3561_v33 = vld [vmem:[%s4574_s15 + $0x10] sm:$0xff] }
 0x46a   : > { %v2084_v35 = vpop.f32.mrf.mxu0  ;;  %2150 = vrot.lane.b32.xlu1 %v2070_v34, %s4145_s22  ;;  %3388 = vmatpush.xpose.msk.msrb.mxu1 %vm2086_vm5, %v2070_v34 }
 0x46b   : > { %v3559_v35 = vld [vmem:[%s4574_s15] sm:$0xff] }
 0x46d   : > { %3389 = vmatmul.msk.f32.vlgmr.msrb.gmra.mxu1 %vm2086_vm5, %v2057_v36 }
 0x46f   : > { %v2058_v37 = vpop.f32.mrf.mxu2  ;;  %v2071_v38 = vpop.f32.mrf.mxu3 }
 0x472   : > { %2148 = vrot.lane.b32.xlu1 %v2057_v36, %s4145_s22 }
 0x4dc   : > { %v2151_v39 = vpop.permute.xlu1 %2150 }
 0x4dd   : > { %3391 = vmatpush.xpose.msk.msrb.mxu3 %vm2086_vm5, %v2151_v39 }
 0x4e4   : > { %v2149_v40 = vpop.permute.xlu1 %2148 }
 0x4e5   : > { %3392 = vmatmul.msk.f32.vlgmr.msrb.gmra.mxu3 %vm2086_vm5, %v2149_v40 }
 0x4ea   : > { %v2110_v41 = vpop.f32.mrf.mxu1 }
 0x4eb   : > { %v2114_v32 = vsel %vm2113_vm6, %v2110_v41, -inf }
 0x4ec   : > { %2115 = vmax.xlane.f32.xlu2 %v2114_v32 }
 0x55f   : > { %v2116_v42 = vpop.xlane.xlu2 %2115 }
 0x560   : > { %v2117_v43 = vsub.f32 %v2110_v41, %v2116_v42  ;;  %v3687_v42 = vld [vmem:[%s1034_s26] ss:$0 sm:$0xff] }
 0x562   : > { %v2118_v44 = vmul.f32 1.442695, %v2117_v43 }
 0x564   : > { %3692 = vpow2.f32 %v2118_v44 }
 0x568   : > { %v2173_v45 = vpop.f32.mrf.mxu3 }
 0x569   : > { %v2176_v46 = vsel %vm2113_vm6, %v2173_v45, -inf }
 0x56a   : > { %v3693_v47 = vpop.eup %3692  ;;  %2177 = vmax.xlane.f32.xlu2 %v2176_v46 }
 0x56b   : > { %v2120_v48 = vsel %vm2113_vm6, %v3693_v47, 0.0 }
 0x56c   : > { %2121 = vadd.xlane.f32.xlu0 %v2120_v48 }
 0x580   : > { %2188 = vrot.lane.b32.xlu0 %v4852_v29, %s4145_s22 }
 0x582   : > { %2216 = vrot.lane.b32.xlu2 %v2070_v34, %s4146_s25 }
 0x588   : > { %2281 = vrot.lane.b32.xlu0 %v2070_v34, %s4147_s18  ;;  %v3560_v34 = vld [vmem:[%s4574_s15 + $0x8] sm:$0xff] }
 0x58a   : > { %2214 = vrot.lane.b32.xlu2 %v2057_v36, %s4146_s25 }
 0x592   : > { %2279 = vrot.lane.b32.xlu2 %v2057_v36, %s4147_s18 }
 0x5dd   : > { %v2178_v49 = vpop.xlane.xlu2 %2177 }
 0x5de   : > { %v2179_v50 = vsub.f32 %v2173_v45, %v2178_v49 }
 0x5df   : > { %v2122_v51 = vpop.xlane.xlu0 %2121 }
 0x5e0   : > { %v2180_v52 = vmul.f32 1.442695, %v2179_v50  ;;  %3694 = vrcp.f32 %v2122_v51 }
 0x5e2   : > { %3696 = vpow2.f32 %v2180_v52 }
 0x5e5   : > { %v2217_v53 = vpop.permute.xlu2 %2216 }
 0x5e6   : > { %v3695_v54 = vpop.eup %3694  ;;  %3394 = vmatpush.xpose.msk.msra.mxu2 %vm2086_vm5, %v2217_v53 }
 0x5e7   : > { %v2124_v55 = vmul.f32 %v3695_v54, %v3693_v47 }
 0x5e8   : > { %v3697_v56 = vpop.eup %3696 }
 0x5e9   : > { %3390 = vmatmul.msk.f32.vlgmr.msrb.gmra.mxu2 %vm2113_vm6, %v2124_v55  ;;  %v2182_v57 = vsel %vm2113_vm6, %v3697_v56, 0.0 }
 0x5ea   : > { %2183 = vadd.xlane.f32.xlu1 %v2182_v57 }
 0x5ed   : > { %v2215_v58 = vpop.permute.xlu2 %2214 }
 0x5f1   : > { %3395 = vmatmul.msk.f32.vlgmr.msra.gmra.mxu2 %vm2086_vm5, %v2215_v58 }
 0x5f2   : > { %v2189_v59 = vpop.permute.xlu0 %2188 }
 0x5f3   : > { %2209 = vmatpush.msra.mxu1 %v2189_v59 }
 0x5f5   : > { %v2280_v1 = vpop.permute.xlu2 %2279 }
 0x5fa   : > { %v2282_v60 = vpop.permute.xlu0 %2281 }
 0x5fb   : > { %3397 = vmatpush.xpose.msk.msrb.mxu1 %vm2086_vm5, %v2282_v60 }
 0x65d   : > { %v2184_v61 = vpop.xlane.xlu1 %2183 }
 0x65e   : > { %3698 = vrcp.f32 %v2184_v61 }
 0x664   : > { %v3699_v62 = vpop.eup %3698 }
 0x665   : > { %v2186_v63 = vmul.f32 %v3699_v62, %v3697_v56 }
 0x667   : > { %3393 = vmatmul.msk.f32.vlgmr.msra.gmra.mxu1 %vm2113_vm6, %v2186_v63 }
 0x66c   : > { %v4876_v0 = vpop.f32.mrf.mxu2 }
 0x66f   : > { %3398 = vmatmul.msk.f32.vlgmr.msrb.gmra.mxu1 %vm2086_vm5, %v2280_v1 }
 0x674   : > { %v2239_v2 = vpop.f32.mrf.mxu2 }
 0x675   : > { %v2242_v3 = vsel %vm2113_vm6, %v2239_v2, -inf }
 0x676   : > { %2243 = vmax.xlane.f32.xlu0 %v2242_v3 }
 0x68a   : > { %2318 = vrot.lane.b32.xlu0 %v4852_v29, %s4147_s18 }
 0x6e4   : > { %v2211_v4 = vpop.f32.mrf.mxu1 }
 0x6e9   : > { %v2244_v6 = vpop.xlane.xlu0 %2243 }
 0x6ea   : > { %v2245_v7 = vsub.f32 %v2239_v2, %v2244_v6 }
 0x6ec   : > { %v2246_v9 = vmul.f32 1.442695, %v2245_v7  ;;  %v2304_v10 = vpop.f32.mrf.mxu1 }
 0x6ed   : > { %v2307_v11 = vsel %vm2113_vm6, %v2304_v10, -inf }
 0x6ee   : > { %3700 = vpow2.f32 %v2246_v9  ;;  %2308 = vmax.xlane.f32.xlu2 %v2307_v11 }
 0x6f4   : > { %v3701_v12 = vpop.eup %3700 }
 0x6f5   : > { %v2248_v13 = vsel %vm2113_vm6, %v3701_v12, 0.0 }
 0x6f6   : > { %2249 = vadd.xlane.f32.xlu1 %v2248_v13 }
 0x6fc   : > { %v2319_v14 = vpop.permute.xlu0 %2318 }
 0x6fd   : > { %2339 = vmatpush.msrb.mxu2 %v2319_v14 }
 0x706   : > { %2345 = vrot.lane.b32.xlu2 %v2211_v4, %s4147_s18 }
 0x761   : > { %v2309_v15 = vpop.xlane.xlu2 %2308 }
 0x762   : > { %v2310_v16 = vsub.f32 %v2304_v10, %v2309_v15 }
 0x764   : > { %v2311_v17 = vmul.f32 1.442695, %v2310_v16 }
 0x766   : > { %3702 = vpow2.f32 %v2311_v17 }
 0x769   : > { %v2250_v20 = vpop.xlane.xlu1 %2249  ;;  %v2346_v37 = vpop.permute.xlu2 %2345 }
 0x76a   : > { %v2356_v38 = vsel %vm2086_vm5, %v4876_v0, %v2346_v37 }
 0x76c   : > { %v3703_v18 = vpop.eup %3702 }
 0x76d   : > { %v2313_v19 = vsel %vm2113_vm6, %v3703_v18, 0.0 }
 0x76e   : > { %2314 = vadd.xlane.f32.xlu1 %v2313_v19 }
 0x787   : > { %2253 = vrot.lane.b32.xlu1 %v4852_v29, %s4146_s25  ;;  %v3563_v29 = vld [vmem:[%s4574_s15 + $0x20] sm:$0xff] }
 0x7e1   : > { %v2315_v21 = vpop.xlane.xlu1 %2314 }
 0x7e2   : > { %3704 = vrcp.f32 %v2315_v21 }
 0x7e3   : > { %3706 = vrcp.f32 %v2250_v20 }
 0x7e8   : > { %v3705_v22 = vpop.eup %3704 }
 0x7e9   : > { %v2317_v23 = vmul.f32 %v3705_v22, %v3703_v18  ;;  %v3707_v5 = vpop.eup %3706 }
 0x7ea   : > { %v2252_v24 = vmul.f32 %v3707_v5, %v3701_v12 }
 0x7eb   : > { %3399 = vmatmul.msk.f32.vlgmr.msrb.gmra.mxu2 %vm2113_vm6, %v2317_v23 }
 0x7f9   : > { %v2254_v25 = vpop.permute.xlu1 %2253 }
 0x7fa   : > { %2274 = vmatpush.msra.mxu3 %v2254_v25 }
 0x7fb   : > { %3396 = vmatmul.msk.f32.vlgmr.msra.gmra.mxu3 %vm2113_vm6, %v2252_v24 }
 0x7fc   : > { %2430 = vmatpush.bf16.msrb.mxu3 %v3566_v26 }
 0x800   : > { %2431 = vmatpush.bf16.msrb.mxu3 %v3565_v27 }
 0x804   : > { %2432 = vmatpush.bf16.msrb.mxu3 %v3564_v28 }
 0x808   : > { %2433 = vmatpush.bf16.msrb.mxu3 %v3563_v29 }
 0x80c   : > { %2434 = vmatpush.bf16.msrb.mxu3 %v3562_v30 }
 0x810   : > { %2435 = vmatpush.bf16.msrb.mxu3 %v3561_v33 }
 0x814   : > { %2436 = vmatpush.bf16.msrb.mxu3 %v3560_v34 }
 0x818   : > { %2437 = vmatpush.bf16.msrb.mxu3 %v3559_v35 }
 0x86e   : > { %v2341_v31 = vpop.f32.mrf.mxu2 }
 0x87e   : > { %v2276_v8 = vpop.f32.mrf.mxu3 }
 0x87f   : > { %2349 = vrot.lane.b32.xlu1 %v2276_v8, %s4146_s25 }
 0x887   : > { %2353 = vrot.lane.b32.xlu1 %v2341_v31, %s4145_s22 }
 0x8f1   : > { %v2350_v36 = vpop.permute.xlu1 %2349 }
 0x8f2   : > { %v2358_v39 = vsel %vm2357_vm7, %v2356_v38, %v2350_v36 }
 0x8f9   : > { %v2354_v40 = vpop.permute.xlu1 %2353 }
 0x8fa   : > { %v2360_v41 = vsel %vm2359_vm8, %v2358_v39, %v2354_v40 }
 0x8fb   : > { %v2361_v32 = vpack.c.bf16 %v2360_v41, %v2360_v41 }
 0x8fd   : > { %2438 = vmatmul.bf16.vlgmr.msrb.gmra.mxu3 %v2361_v32 }
 0x980   : > { %v2439_v43 = vpop.f32.mrf.mxu3 }
 0x981   : > { %v2440_v44 = vadd.f32 %v3687_v42, %v2439_v43 }
 0x984   : > { %2446 = sbr.rel (%p2889_p9) target bundleno = 2443 (0x98b), region = 144 }
 0x988   : > { %v2441_v45 = vpop.f32.mrf.mxu3 }
 0x989   : > { %v3708_v46 = vld [vmem:[%s5091_s27] ss:$0 sm:$0xff] }
 0x98a   : > { %2451 = vst [vmem:[#allocation2] sm:$0xff] %v3708_v46 }
 0x98b PF: > { %v2468_v47 = vld [vmem:[%s4577_s23 + $0x78] sm:$0xff]  ;;  %v2467_v48 = vld [vmem:[%s4577_s23 + $0x70] sm:$0xff]  ;;  %v2466_v49 = vld [vmem:[%s4577_s23 + $0x68] sm:$0xff]  ;;  %p3433_p5 = scmp.ne.s32.totalorder %s4268_s1, 1 }
 0x98c   : > { %2469 = vmatpush.msra.mxu0 %v2468_v47  ;;  %v2465_v50 = vld [vmem:[%s4577_s23 + $0x60] sm:$0xff]  ;;  %v2464_v51 = vld [vmem:[%s4577_s23 + $0x58] sm:$0xff]  ;;  %v2463_v52 = vld [vmem:[%s4577_s23 + $0x50] sm:$0xff]  ;;  %s5092_s20 = sld [smem:[#allocation45_spill]] (!%p3433_p5) }
 0x98d   : > { %v2462_v53 = vld [vmem:[%s4577_s23 + $0x48] sm:$0xff]  ;;  %v2461_v54 = vld [vmem:[%s4577_s23 + $0x40] sm:$0xff]  ;;  %v2460_v55 = vld [vmem:[%s4577_s23 + $0x38] sm:$0xff]  ;;  %s5094_s10 = sld [smem:[#allocation46_spill]] (!%p3433_p5) }
 0x98e   : > { %2470 = vmatpush.msra.mxu0 %v2467_v48  ;;  %v2459_v56 = vld [vmem:[%s4577_s23 + $0x30] sm:$0xff]  ;;  %v2458_v57 = vld [vmem:[%s4577_s23 + $0x28] sm:$0xff]  ;;  %v2457_v58 = vld [vmem:[%s4577_s23 + $0x20] sm:$0xff]  ;;  %s5095_s18 = sld [smem:[#allocation48_spill]] (!%p3433_p5) }
 0x98f   : > { %v2456_v59 = vld [vmem:[%s4577_s23 + $0x18] sm:$0xff]  ;;  %v2455_v60 = vld [vmem:[%s4577_s23 + $0x10] sm:$0xff]  ;;  %v2454_v61 = vld [vmem:[%s4577_s23 + $0x8] sm:$0xff] }
 0x990   : > { %2471 = vmatpush.msra.mxu0 %v2466_v49  ;;  %v2453_v62 = vld [vmem:[%s4577_s23] sm:$0xff] }
 0x991   : > { %v2452_v63 = vld [vmem:[#allocation2] sm:$0xff] }
 0x992   : > { %2472 = vmatpush.msra.mxu0 %v2465_v50  ;;  %s5093_s3 = smov (!%p3433_p5), %s5092_s20 }
 0x994   : > { %2473 = vmatpush.msra.mxu0 %v2464_v51 }
 0x996   : > { %2474 = vmatpush.msra.mxu0 %v2463_v52 }
 0x998   : > { %2475 = vmatpush.msra.mxu0 %v2462_v53 }
 0x99a   : > { %2476 = vmatpush.msra.mxu0 %v2461_v54 }
 0x99c   : > { %2477 = vmatpush.msra.mxu0 %v2460_v55 }
 0x99e   : > { %2478 = vmatpush.msra.mxu0 %v2459_v56 }
 0x9a0   : > { %2479 = vmatpush.msra.mxu0 %v2458_v57 }
 0x9a2   : > { %2480 = vmatpush.msra.mxu0 %v2457_v58 }
 0x9a4   : > { %2481 = vmatpush.msra.mxu0 %v2456_v59 }
 0x9a6   : > { %2482 = vmatpush.msra.mxu0 %v2455_v60 }
 0x9a8   : > { %2483 = vmatpush.msra.mxu0 %v2454_v61 }
 0x9aa   : > { %2484 = vmatpush.msra.mxu0 %v2453_v62 }
 0x9ab   : > { %2485 = vmatmul.f32.vlgmr.msra.gmra.mxu0 %v2440_v44 }
 0xa27   : > { %2494 = sbr.rel (%p3433_p5) target bundleno = 2914 (0xb62), region = 148 }
 0xa28   : > { %v2486_v0 = vpop.f32.mrf.mxu0 }
 0xa29   : > { %v2489_v1 = vadd.f32 %v2486_v0, %v2452_v63 }
 0xa2b   : > { %2490 = vst [vmem:[#allocation2] sm:$0xff] %v2489_v1 }
 0xa2c   : > { %v2520_v2 = vld [vmem:[%s5092_s20 + $0x78] sm:$0xff]  ;;  %v2519_v3 = vld [vmem:[%s5093_s3 + $0x70] sm:$0xff]  ;;  %v2518_v4 = vld [vmem:[%s5093_s3 + $0x68] sm:$0xff] }
 0xa2d   : > { %2525 = vmatpush.msra.mxu0 %v2520_v2  ;;  %v2517_v6 = vld [vmem:[%s5093_s3 + $0x60] sm:$0xff]  ;;  %v2516_v9 = vld [vmem:[%s5093_s3 + $0x58] sm:$0xff]  ;;  %v2515_v11 = vld [vmem:[%s5093_s3 + $0x50] sm:$0xff] }
 0xa2e   : > { %v2514_v13 = vld [vmem:[%s5093_s3 + $0x48] sm:$0xff]  ;;  %v2513_v15 = vld [vmem:[%s5093_s3 + $0x40] sm:$0xff]  ;;  %v2512_v17 = vld [vmem:[%s5093_s3 + $0x38] sm:$0xff] }
 0xa2f   : > { %2526 = vmatpush.msra.mxu0 %v2519_v3  ;;  %v2511_v19 = vld [vmem:[%s5093_s3 + $0x30] sm:$0xff]  ;;  %v2510_v20 = vld [vmem:[%s5093_s3 + $0x28] sm:$0xff]  ;;  %v2509_v21 = vld [vmem:[%s5093_s3 + $0x20] sm:$0xff] }
 0xa30   : > { %v2508_v23 = vld [vmem:[%s5093_s3 + $0x18] sm:$0xff]  ;;  %v2507_v5 = vld [vmem:[%s5093_s3 + $0x10] sm:$0xff]  ;;  %v2506_v26 = vld [vmem:[%s5093_s3 + $0x8] sm:$0xff] }
 0xa31   : > { %2527 = vmatpush.msra.mxu0 %v2518_v4  ;;  %v2505_v27 = vld [vmem:[%s5093_s3] sm:$0xff]  ;;  %v2560_v30 = vld [vmem:[#allocation20 + $0x30] sm:$0xff]  ;;  %v2559_v8 = vld [vmem:[#allocation20 + $0x28] sm:$0xff] }
 0xa32   : > { %v2495_v7 = vld [vmem:[#allocation2] sm:$0xff]  ;;  %v2558_v31 = vld [vmem:[#allocation20 + $0x20] sm:$0xff]  ;;  %v2556_v34 = vld [vmem:[#allocation20 + $0x10] sm:$0xff] }
 0xa33   : > { %v2497_v10 = vmul.f32 0.044715, %v2495_v7  ;;  %2528 = vmatpush.msra.mxu0 %v2517_v6  ;;  %v2496_v24 = vmul.f32 0.5, %v2495_v7  ;;  %v2561_v29 = vld [vmem:[#allocation20 + $0x38] sm:$0xff]  ;;  %v2555_v35 = vld [vmem:[#allocation20 + $0x8] sm:$0xff]  ;;  %v2554_v36 = vld [vmem:[#allocation20] sm:$0xff] }
 0xa34   : > { %2577 = vmatpush.msra.mxu1 %v2561_v29  ;;  %v2557_v33 = vld [vmem:[#allocation20 + $0x18] sm:$0xff] }
 0xa35   : > { %v2498_v12 = vmul.f32 %v2497_v10, %v2495_v7  ;;  %2529 = vmatpush.msra.mxu0 %v2516_v9  ;;  %v3709_v37 = vld [vmem:[%s5094_s10] ss:$0 sm:$0xff] }
 0xa36   : > { %2578 = vmatpush.msra.mxu1 %v2560_v30  ;;  %v3710_v48 = vld [vmem:[%s5095_s18] ss:$0 sm:$0xff] }
 0xa37   : > { %v2499_v14 = vmul.f32 %v2498_v12, %v2495_v7  ;;  %2530 = vmatpush.msra.mxu0 %v2515_v11 }
 0xa38   : > { %2579 = vmatpush.msra.mxu1 %v2559_v8 }
 0xa39   : > { %v2500_v16 = vadd.f32 %v2499_v14, %v2495_v7  ;;  %2531 = vmatpush.msra.mxu0 %v2514_v13 }
 0xa3a   : > { %2580 = vmatpush.msra.mxu1 %v2558_v31 }
 0xa3b   : > { %v2501_v18 = vmul.f32 0.7978846, %v2500_v16  ;;  %2532 = vmatpush.msra.mxu0 %v2513_v15 }
 0xa3c   : > { %2581 = vmatpush.msra.mxu1 %v2557_v33 }
 0xa3d   : > { %3711 = vtanh.f32 %v2501_v18  ;;  %2533 = vmatpush.msra.mxu0 %v2512_v17 }
 0xa3e   : > { %2582 = vmatpush.msra.mxu1 %v2556_v34 }
 0xa3f   : > { %2534 = vmatpush.msra.mxu0 %v2511_v19 }
 0xa40   : > { %2583 = vmatpush.msra.mxu1 %v2555_v35 }
 0xa41   : > { %2535 = vmatpush.msra.mxu0 %v2510_v20 }
 0xa42   : > { %2584 = vmatpush.msra.mxu1 %v2554_v36 }
 0xa43   : > { %v3712_v22 = vpop.eup %3711  ;;  %2536 = vmatpush.msra.mxu0 %v2509_v21 }
 0xa44   : > { %v2503_v25 = vadd.f32 1.0, %v3712_v22 }
 0xa45   : > { %2537 = vmatpush.msra.mxu0 %v2508_v23 }
 0xa46   : > { %v2504_v28 = vmul.f32 %v2503_v25, %v2496_v24 }
 0xa47   : > { %2538 = vmatpush.msra.mxu0 %v2507_v5 }
 0xa49   : > { %2539 = vmatpush.msra.mxu0 %v2506_v26 }
 0xa4b   : > { %2540 = vmatpush.msra.mxu0 %v2505_v27 }
 0xa4c   : > { %2541 = vmatmul.f32.vlgmr.msra.gmra.mxu0 %v2504_v28 }
 0xac9   : > { %v2542_v38 = vpop.f32.mrf.mxu0 }
 0xaca   : > { %v2543_v39 = vadd.f32 %v3709_v37, %v2542_v38 }
 0xacc   : > { %v2546_v40 = vmul.f32 0.044715, %v2543_v39  ;;  %v2545_v45 = vmul.f32 0.5, %v2543_v39 }
 0xace   : > { %v2547_v41 = vmul.f32 %v2546_v40, %v2543_v39 }
 0xad0   : > { %v2548_v32 = vmul.f32 %v2547_v41, %v2543_v39 }
 0xad2   : > { %v2549_v42 = vadd.f32 %v2548_v32, %v2543_v39 }
 0xad4   : > { %v2550_v43 = vmul.f32 0.7978846, %v2549_v42 }
 0xad6   : > { %3713 = vtanh.f32 %v2550_v43 }
 0xadc   : > { %v3714_v44 = vpop.eup %3713 }
 0xadd   : > { %v2552_v46 = vadd.f32 1.0, %v3714_v44 }
 0xadf   : > { %v2553_v47 = vmul.f32 %v2552_v46, %v2545_v45 }
 0xae1   : > { %3434 = vmatmul.msk.f32.vlgmr.msra.gmra.mxu1 %vm2357_vm7, %v2553_v47 }
 0xb5e   : > { %v2586_v49 = vpop.f32.mrf.mxu1 }
 0xb5f   : > { %v2587_v50 = vadd.f32 %v3710_v48, %v2586_v49 }
 0xb61   : > { %2589 = vst [vmem:[#allocation21] sm:$0xff] %v2587_v50 }
 0xb62 PF: > { %p3638_p8 = scmp.eq.s32.totalorder %s4268_s1, 1  ;;  %s4148_s21 = smov [#allocation21]  }
 0xb63   : > { %s2596_s24 = sshll.u32 %s4148_s21, 4  ;;  %s5096_s15 = sld [smem:[#allocation49_spill]]  ;;  %s2597_s24 = int_to_ptr.vmem [resolvable:$true] %s2596_s24 }
 0xb69   : > { %s2598_s5 = sshll.u32 %s5096_s15, 4  ;;  %s2599_s5 = int_to_ptr.hbm [resolvable:$true] %s2598_s5 }
 0xb6a   : > { %3597 = dma.vmem_to_hbm [thread:$0]  (%p3638_p8), %s2597_s24, 128, %s2599_s5, [#allocation5]  }
 0xb6b   : > { %4118 = dma.done.wait (%p3638_p8), [#allocation5], 128  }
 0xb6c   : > { %4120 = vsyncadd (%p3638_p8), [#allocation5], 4294967168 }
 0xb6d PF: > { %s5097_s21 = sld [smem:[#allocation31_spill]]  ;;  %s5100_s0 = smov %s4127_s30 }
 0xb6e   : > { %s5098_s27 = sld [smem:[#allocation30_spill]] }
 0xb6f   : > { %s5099_s20 = sld [smem:[#allocation32_spill]] }
 0xb73   : > { %p45_p9 = scmp.ge.s32.totalorder %s5097_s21, 4  }
 0xb74   : > { %s5101_s30 = smov %s5098_s27 }
 0xb75   :  { %47 = sbr.rel (!%p45_p9) target bundleno = 32 (0x20), region = 266 }
 0xb7a   :  { %2612 = vsyncpa [#allocation4], 1 }
 0xb7b   :  { %2614 = vsyncpa [#allocation4 + $0x1], 1 }
 0xb7c   :  { %2615 = vsyncpa [#allocation7], 1 }
 0xb7d   :  { %2617 = vsyncpa [#allocation7 + $0x1], 1 }
 0xb7e   :  { %2618 = vsyncpa [#allocation10], 1 }
 0xb7f   :  { %2620 = vsyncpa [#allocation10 + $0x1], 1 }
 0xb80   :  { %2621 = vsyncpa [#allocation13], 1 }
 0xb81   :  { %2623 = vsyncpa [#allocation13 + $0x1], 1 }
 0xb82   :  { %2624 = vsyncpa [#allocation16], 1 }
 0xb83   :  { %2626 = vsyncpa [#allocation16 + $0x1], 1 }
 0xb84   :  { %2627 = vsyncpa [#allocation19], 1 }
 0xb85   :  { %2629 = vsyncpa [#allocation19 + $0x1], 1 }
 0xb86   :  { %2630 = vsyncpa [#allocation5], 1 }
 0xb87   :  { %2632 = vsyncpa [#allocation5 + $0x1], 1 }

</bundles_post_ra>
